<compile_context>
chip_gen: v6e
topology: v6e:2x2x1
jax: 0.10.0
libtpu: 0.0.40
codegen_flags: <defaults>
</compile_context>

<pallas_src>
import jax
import jax.numpy as jnp
from jax import lax
from jax.experimental import pallas as pl
from jax.experimental.pallas import tpu as pltpu

HIDDEN_SIZE = 32
INPUT_SIZE = 1
NUM_LAYERS = 2


def _cell_update(gates, c, H):
    """LSTM cell nonlinearity, PyTorch gate order (i, f, g, o).

    One full-width sigmoid (one EUP push for i/f/o) + one tanh on the g slice,
    instead of four separate 32-lane transcendental calls.
    """
    sig = jax.nn.sigmoid(gates)            # (B, 4H) — single EUP push
    i = sig[:, 0 * H:1 * H]
    f = sig[:, 1 * H:2 * H]
    o = sig[:, 3 * H:4 * H]
    g = jnp.tanh(gates[:, 2 * H:3 * H])
    c_new = f * c + i * g
    h_new = o * jnp.tanh(c_new)
    return h_new, c_new


def lstm_kernel(x_ref,                       # (T, B, 1)   time-major input
                wih1_ref, whh1_ref, b1_ref,  # layer 0: (1,4H), (H,4H), (1,4H)
                w2s_ref, b2_ref,             # layer 1: (2H,4H) stacked, (1,4H)
                wfc_ref, bfc_ref,            # head:    (H,1), (1,1)
                out_ref,                     # (B, 1)
                xw1_ref):                    # VMEM scratch (T, B, 4H)
    T, B, _ = x_ref.shape
    H = whh1_ref.shape[0]

    whh1 = whh1_ref[...]          # (H, 4H)   hoisted loads
    w2s = w2s_ref[...]            # (2H, 4H)

    # Hoist the K=1 layer-0 input projection out of the recurrent loop:
    # pure VPU broadcast math, with the layer-0 bias folded in.
    #   (T,B,1) * (1,1,4H) + (1,1,4H) -> (T,B,4H)
    xw1_ref[...] = (x_ref[...] * wih1_ref[...][None, :, :]
                    + b1_ref[...][None, :, :])

    # Pre-broadcast the layer-1 bias once (not re-broadcast per iteration).
    b2 = jnp.broadcast_to(b2_ref[...], (B, 4 * H))

    def step(t, carry):
        h1, c1, h2, c2 = carry

        # Layer 0: only the recurrent matmul remains on the serial chain.
        gates1 = xw1_ref[t] + jnp.dot(h1, whh1,
                                      preferred_element_type=jnp.float32)
        h1, c1 = _cell_update(gates1, c1, H)

        # Layer 1: fused input+recurrent matmul — one (B,2H)@(2H,4H) dot.
        hcat = jnp.concatenate([h1, h2], axis=-1)          # (B, 2H)
        gates2 = jnp.dot(hcat, w2s,
                         preferred_element_type=jnp.float32) + b2
        h2, c2 = _cell_update(gates2, c2, H)
        return (h1, c1, h2, c2)

    zeros = jnp.zeros((B, H), dtype=jnp.float32)
    # Unroll so the scheduler can software-pipeline layer-1(t+1) with layer-2(t).
    unroll = True if T <= 32 else 8
    h1, c1, h2, c2 = lax.fori_loop(0, T, step, (zeros, zeros, zeros, zeros),
                                   unroll=unroll)

    # fc1 head on the last-timestep hidden state of the top layer.
    out_ref[...] = (
        jnp.dot(h2, wfc_ref[...], preferred_element_type=jnp.float32)
        + bfc_ref[...]
    )


@jax.jit
def lstm_model_forward(x, params):
    """x: (B, T, INPUT_SIZE) float32 (batch_first, like the PyTorch module)."""
    B, T, _ = x.shape
    H = HIDDEN_SIZE
    x_tm = jnp.transpose(x, (1, 0, 2))   # time-major (T, B, I)

    args = (
        x_tm,
        params["wih1_t"], params["whh1_t"], params["b1"],
        params["w2s"], params["b2"],
        params["wfc_t"], params["bfc"],
    )

    vmem = pl.BlockSpec(memory_space=pltpu.MemorySpace.VMEM)
    return pl.pallas_call(
        lstm_kernel,
        out_shape=jax.ShapeDtypeStruct((B, 1), jnp.float32),
        in_specs=[vmem] * len(args),
        out_specs=vmem,
        scratch_shapes=[pltpu.VMEM((T, B, 4 * H), jnp.float32)],
    )(*args)
    # TODO(synk): for large B, add a batch grid axis with
    # dimension_semantics=("parallel",) so v7x's two TensorCores split the batch.


def init_params(key, input_size=INPUT_SIZE, hidden_size=HIDDEN_SIZE):
    """Deterministic PyTorch-style uniform(-1/sqrt(H), 1/sqrt(H)) init."""
    H = hidden_size
    bound = 1.0 / jnp.sqrt(jnp.float32(H))
    ks = jax.random.split(key, 10)

    def u(k, shape):
        return jax.random.uniform(k, shape, jnp.float32, -bound, bound)

    wih1 = u(ks[0], (4 * H, input_size))
    whh1 = u(ks[1], (4 * H, H))
    bih1 = u(ks[2], (4 * H,))
    bhh1 = u(ks[3], (4 * H,))
    wih2 = u(ks[4], (4 * H, H))
    whh2 = u(ks[5], (4 * H, H))
    bih2 = u(ks[6], (4 * H,))
    bhh2 = u(ks[7], (4 * H,))
    wfc = u(ks[8], (1, H))
    bfc = u(ks[9], (1,))

    wih2_t = wih2.T   # (H, 4H)
    whh2_t = whh2.T   # (H, 4H)
    return {
        # kernel params (pre-transposed / pre-stacked)
        "wih1_t": wih1.T,                                   # (I, 4H)
        "whh1_t": whh1.T,                                   # (H, 4H)
        "b1": (bih1 + bhh1)[None, :],                       # (1, 4H)
        "w2s": jnp.concatenate([wih2_t, whh2_t], axis=0),   # (2H, 4H)
        "b2": (bih2 + bhh2)[None, :],                       # (1, 4H)
        "wfc_t": wfc.T,                                     # (H, 1)
        "bfc": bfc[None, :],                                # (1, 1)
        # un-stacked copies for the pure-JAX reference
        "wih2_t": wih2_t, "whh2_t": whh2_t,
    }


def _lstm_cell_ref(x_t, h, c, w_ih_t, w_hh_t, b, H):
    gates = x_t @ w_ih_t + h @ w_hh_t + b
    i = jax.nn.sigmoid(gates[:, 0 * H:1 * H])
    f = jax.nn.sigmoid(gates[:, 1 * H:2 * H])
    g = jnp.tanh(gates[:, 2 * H:3 * H])
    o = jax.nn.sigmoid(gates[:, 3 * H:4 * H])
    c_new = f * c + i * g
    return o * jnp.tanh(c_new), c_new


def reference_forward(x, params):
    """Pure-JAX reference matching torch.nn.LSTM(batch_first) + Linear."""
    B, T, _ = x.shape
    H = HIDDEN_SIZE
    h1 = c1 = h2 = c2 = jnp.zeros((B, H), jnp.float32)
    for t in range(T):
        x_t = x[:, t, :]
        h1, c1 = _lstm_cell_ref(x_t, h1, c1, params["wih1_t"],
                                params["whh1_t"], params["b1"], H)
        h2, c2 = _lstm_cell_ref(h1, h2, c2, params["wih2_t"],
                                params["whh2_t"], params["b2"], H)
    return h2 @ params["wfc_t"] + params["bfc"]


if __name__ == "__main__":
    key = jax.random.PRNGKey(0)
    k_param, k_x = jax.random.split(key)

    B, T = 2, 8
    x = jax.random.normal(k_x, (B, T, INPUT_SIZE), dtype=jnp.float32)
    params = init_params(k_param)

    out = lstm_model_forward(x, params)
    out = jax.block_until_ready(out)

    ref = reference_forward(x, params)
    assert out.shape == (B, 1), out.shape
    assert jnp.allclose(out, ref, rtol=1e-5, atol=1e-5), (out, ref)

    print("KERNEL_OK")
</pallas_src>

<mosaic_0001>
module attributes {stable_mosaic.version = 11 : i64} {
  func.func @lstm_kernel(%arg0: memref<8x2x1xf32, #tpu.memory_space<vmem>>, %arg1: memref<1x128xf32, #tpu.memory_space<vmem>>, %arg2: memref<32x128xf32, #tpu.memory_space<vmem>>, %arg3: memref<1x128xf32, #tpu.memory_space<vmem>>, %arg4: memref<64x128xf32, #tpu.memory_space<vmem>>, %arg5: memref<1x128xf32, #tpu.memory_space<vmem>>, %arg6: memref<32x1xf32, #tpu.memory_space<vmem>>, %arg7: memref<1x1xf32, #tpu.memory_space<vmem>>, %arg8: memref<2x1xf32, #tpu.memory_space<vmem>>, %arg9: memref<8x2x128xf32, #tpu.memory_space<vmem>>) attributes {dimension_semantics = [], scalar_prefetch = 0 : i64, scratch_operands = 1 : i64, tpu.core_type = #tpu.core_type<tc>} {
    %c0 = arith.constant 0 : index
    %c0_0 = arith.constant 0 : index
    %0 = vector.load %arg2[%c0, %c0_0] : memref<32x128xf32, #tpu.memory_space<vmem>>, vector<32x128xf32>
    %c0_1 = arith.constant 0 : index
    %c0_2 = arith.constant 0 : index
    %1 = vector.load %arg4[%c0_1, %c0_2] : memref<64x128xf32, #tpu.memory_space<vmem>>, vector<64x128xf32>
    %c0_3 = arith.constant 0 : index
    %c0_4 = arith.constant 0 : index
    %c0_5 = arith.constant 0 : index
    %2 = vector.load %arg0[%c0_3, %c0_4, %c0_5] : memref<8x2x1xf32, #tpu.memory_space<vmem>>, vector<8x2x1xf32>
    %c0_6 = arith.constant 0 : index
    %c0_7 = arith.constant 0 : index
    %3 = vector.load %arg1[%c0_6, %c0_7] : memref<1x128xf32, #tpu.memory_space<vmem>>, vector<1x128xf32>
    %4 = vector.shape_cast %3 : vector<1x128xf32> to vector<1x1x128xf32>
    %5 = vector.broadcast %2 : vector<8x2x1xf32> to vector<8x2x128xf32>
    %6 = vector.broadcast %4 : vector<1x1x128xf32> to vector<8x2x128xf32>
    %7 = arith.mulf %5, %6 : vector<8x2x128xf32>
    %c0_8 = arith.constant 0 : index
    %c0_9 = arith.constant 0 : index
    %8 = vector.load %arg3[%c0_8, %c0_9] : memref<1x128xf32, #tpu.memory_space<vmem>>, vector<1x128xf32>
    %9 = vector.shape_cast %8 : vector<1x128xf32> to vector<1x1x128xf32>
    %10 = vector.broadcast %9 : vector<1x1x128xf32> to vector<8x2x128xf32>
    %11 = arith.addf %7, %10 : vector<8x2x128xf32>
    %c0_10 = arith.constant 0 : index
    %c0_11 = arith.constant 0 : index
    %c0_12 = arith.constant 0 : index
    %12 = vector.load %arg9[%c0_10, %c0_11, %c0_12] : memref<8x2x128xf32, #tpu.memory_space<vmem>>, vector<8x2x128xf32>
    tpu.vector_store %arg9[%c0_10, %c0_11, %c0_12], %11 {strides = array<i32>} : memref<8x2x128xf32, #tpu.memory_space<vmem>>, vector<8x2x128xf32>,
    %c0_13 = arith.constant 0 : index
    %c0_14 = arith.constant 0 : index
    %13 = vector.load %arg5[%c0_13, %c0_14] : memref<1x128xf32, #tpu.memory_space<vmem>>, vector<1x128xf32>
    %14 = vector.shape_cast %13 : vector<1x128xf32> to vector<1x128xf32>
    %15 = vector.broadcast %14 : vector<1x128xf32> to vector<2x128xf32>
    %cst = arith.constant 0.000000e+00 : f32
    %16 = vector.broadcast %cst : f32 to vector<2x32xf32>
    %c0_i32 = arith.constant 0 : i32
    %17 = arith.index_cast %c0_i32 : i32 to index
    %c0_15 = arith.constant 0 : index
    %c0_16 = arith.constant 0 : index
    %18 = vector.load %arg9[%17, %c0_15, %c0_16] : memref<8x2x128xf32, #tpu.memory_space<vmem>>, vector<1x2x128xf32>
    %19 = vector.shape_cast %18 : vector<1x2x128xf32> to vector<2x128xf32>
    %cst_17 = arith.constant dense<0.000000e+00> : vector<2x128xf32>
    %20 = tpu.matmul %16, %0, %cst_17 {dimension_numbers = #tpu.dot_dimension_numbers<[1], [0], [0], [1], [0, 0, 1, 1], [], []>} : vector<2x32xf32>, vector<32x128xf32>, vector<2x128xf32> -> vector<2x128xf32>
    %21 = arith.addf %19, %20 : vector<2x128xf32>
    %22 = arith.negf %21 : vector<2x128xf32>
    %23 = math.exp %22 : vector<2x128xf32>
    %cst_18 = arith.constant 1.000000e+00 : f32
    %24 = vector.broadcast %cst_18 : f32 to vector<2x128xf32>
    %25 = arith.addf %24, %23 : vector<2x128xf32>
    %26 = arith.divf %24, %25 : vector<2x128xf32>
    %27 = vector.extract_strided_slice %26 {offsets = [0, 0], sizes = [2, 32], strides = [1, 1]} : vector<2x128xf32> to vector<2x32xf32>
    %28 = vector.extract_strided_slice %26 {offsets = [0, 32], sizes = [2, 32], strides = [1, 1]} : vector<2x128xf32> to vector<2x32xf32>
    %29 = vector.extract_strided_slice %26 {offsets = [0, 96], sizes = [2, 32], strides = [1, 1]} : vector<2x128xf32> to vector<2x32xf32>
    %30 = vector.extract_strided_slice %21 {offsets = [0, 64], sizes = [2, 32], strides = [1, 1]} : vector<2x128xf32> to vector<2x32xf32>
    %31 = math.tanh %30 : vector<2x32xf32>
    %32 = arith.mulf %28, %16 : vector<2x32xf32>
    %33 = arith.mulf %27, %31 : vector<2x32xf32>
    %34 = arith.addf %32, %33 : vector<2x32xf32>
    %35 = math.tanh %34 : vector<2x32xf32>
    %36 = arith.mulf %29, %35 : vector<2x32xf32>
    %37 = tpu.concatenate %36, %16 in 1 : vector<2x32xf32>, vector<2x32xf32> -> vector<2x64xf32>
    %cst_19 = arith.constant dense<0.000000e+00> : vector<2x128xf32>
    %38 = tpu.matmul %37, %1, %cst_19 {dimension_numbers = #tpu.dot_dimension_numbers<[1], [0], [0], [1], [0, 0, 1, 1], [], []>} : vector<2x64xf32>, vector<64x128xf32>, vector<2x128xf32> -> vector<2x128xf32>
    %39 = arith.addf %38, %15 : vector<2x128xf32>
    %40 = arith.negf %39 : vector<2x128xf32>
    %41 = math.exp %40 : vector<2x128xf32>
    %cst_20 = arith.constant 1.000000e+00 : f32
    %42 = vector.broadcast %cst_20 : f32 to vector<2x128xf32>
    %43 = arith.addf %42, %41 : vector<2x128xf32>
    %44 = arith.divf %42, %43 : vector<2x128xf32>
    %45 = vector.extract_strided_slice %44 {offsets = [0, 0], sizes = [2, 32], strides = [1, 1]} : vector<2x128xf32> to vector<2x32xf32>
    %46 = vector.extract_strided_slice %44 {offsets = [0, 32], sizes = [2, 32], strides = [1, 1]} : vector<2x128xf32> to vector<2x32xf32>
    %47 = vector.extract_strided_slice %44 {offsets = [0, 96], sizes = [2, 32], strides = [1, 1]} : vector<2x128xf32> to vector<2x32xf32>
    %48 = vector.extract_strided_slice %39 {offsets = [0, 64], sizes = [2, 32], strides = [1, 1]} : vector<2x128xf32> to vector<2x32xf32>
    %49 = math.tanh %48 : vector<2x32xf32>
    %50 = arith.mulf %46, %16 : vector<2x32xf32>
    %51 = arith.mulf %45, %49 : vector<2x32xf32>
    %52 = arith.addf %50, %51 : vector<2x32xf32>
    %53 = math.tanh %52 : vector<2x32xf32>
    %54 = arith.mulf %47, %53 : vector<2x32xf32>
    %c1_i32 = arith.constant 1 : i32
    %55 = arith.index_cast %c1_i32 : i32 to index
    %c0_21 = arith.constant 0 : index
    %c0_22 = arith.constant 0 : index
    %56 = vector.load %arg9[%55, %c0_21, %c0_22] : memref<8x2x128xf32, #tpu.memory_space<vmem>>, vector<1x2x128xf32>
    %57 = vector.shape_cast %56 : vector<1x2x128xf32> to vector<2x128xf32>
    %cst_23 = arith.constant dense<0.000000e+00> : vector<2x128xf32>
    %58 = tpu.matmul %36, %0, %cst_23 {dimension_numbers = #tpu.dot_dimension_numbers<[1], [0], [0], [1], [0, 0, 1, 1], [], []>} : vector<2x32xf32>, vector<32x128xf32>, vector<2x128xf32> -> vector<2x128xf32>
    %59 = arith.addf %57, %58 : vector<2x128xf32>
    %60 = arith.negf %59 : vector<2x128xf32>
    %61 = math.exp %60 : vector<2x128xf32>
    %cst_24 = arith.constant 1.000000e+00 : f32
    %62 = vector.broadcast %cst_24 : f32 to vector<2x128xf32>
    %63 = arith.addf %62, %61 : vector<2x128xf32>
    %64 = arith.divf %62, %63 : vector<2x128xf32>
    %65 = vector.extract_strided_slice %64 {offsets = [0, 0], sizes = [2, 32], strides = [1, 1]} : vector<2x128xf32> to vector<2x32xf32>
    %66 = vector.extract_strided_slice %64 {offsets = [0, 32], sizes = [2, 32], strides = [1, 1]} : vector<2x128xf32> to vector<2x32xf32>
    %67 = vector.extract_strided_slice %64 {offsets = [0, 96], sizes = [2, 32], strides = [1, 1]} : vector<2x128xf32> to vector<2x32xf32>
    %68 = vector.extract_strided_slice %59 {offsets = [0, 64], sizes = [2, 32], strides = [1, 1]} : vector<2x128xf32> to vector<2x32xf32>
    %69 = math.tanh %68 : vector<2x32xf32>
    %70 = arith.mulf %66, %34 : vector<2x32xf32>
    %71 = arith.mulf %65, %69 : vector<2x32xf32>
    %72 = arith.addf %70, %71 : vector<2x32xf32>
    %73 = math.tanh %72 : vector<2x32xf32>
    %74 = arith.mulf %67, %73 : vector<2x32xf32>
    %75 = tpu.concatenate %74, %54 in 1 : vector<2x32xf32>, vector<2x32xf32> -> vector<2x64xf32>
    %cst_25 = arith.constant dense<0.000000e+00> : vector<2x128xf32>
    %76 = tpu.matmul %75, %1, %cst_25 {dimension_numbers = #tpu.dot_dimension_numbers<[1], [0], [0], [1], [0, 0, 1, 1], [], []>} : vector<2x64xf32>, vector<64x128xf32>, vector<2x128xf32> -> vector<2x128xf32>
    %77 = arith.addf %76, %15 : vector<2x128xf32>
    %78 = arith.negf %77 : vector<2x128xf32>
    %79 = math.exp %78 : vector<2x128xf32>
    %cst_26 = arith.constant 1.000000e+00 : f32
    %80 = vector.broadcast %cst_26 : f32 to vector<2x128xf32>
    %81 = arith.addf %80, %79 : vector<2x128xf32>
    %82 = arith.divf %80, %81 : vector<2x128xf32>
    %83 = vector.extract_strided_slice %82 {offsets = [0, 0], sizes = [2, 32], strides = [1, 1]} : vector<2x128xf32> to vector<2x32xf32>
    %84 = vector.extract_strided_slice %82 {offsets = [0, 32], sizes = [2, 32], strides = [1, 1]} : vector<2x128xf32> to vector<2x32xf32>
    %85 = vector.extract_strided_slice %82 {offsets = [0, 96], sizes = [2, 32], strides = [1, 1]} : vector<2x128xf32> to vector<2x32xf32>
    %86 = vector.extract_strided_slice %77 {offsets = [0, 64], sizes = [2, 32], strides = [1, 1]} : vector<2x128xf32> to vector<2x32xf32>
    %87 = math.tanh %86 : vector<2x32xf32>
    %88 = arith.mulf %84, %52 : vector<2x32xf32>
    %89 = arith.mulf %83, %87 : vector<2x32xf32>
    %90 = arith.addf %88, %89 : vector<2x32xf32>
    %91 = math.tanh %90 : vector<2x32xf32>
    %92 = arith.mulf %85, %91 : vector<2x32xf32>
    %c2_i32 = arith.constant 2 : i32
    %93 = arith.index_cast %c2_i32 : i32 to index
    %c0_27 = arith.constant 0 : index
    %c0_28 = arith.constant 0 : index
    %94 = vector.load %arg9[%93, %c0_27, %c0_28] : memref<8x2x128xf32, #tpu.memory_space<vmem>>, vector<1x2x128xf32>
    %95 = vector.shape_cast %94 : vector<1x2x128xf32> to vector<2x128xf32>
    %cst_29 = arith.constant dense<0.000000e+00> : vector<2x128xf32>
    %96 = tpu.matmul %74, %0, %cst_29 {dimension_numbers = #tpu.dot_dimension_numbers<[1], [0], [0], [1], [0, 0, 1, 1], [], []>} : vector<2x32xf32>, vector<32x128xf32>, vector<2x128xf32> -> vector<2x128xf32>
    %97 = arith.addf %95, %96 : vector<2x128xf32>
    %98 = arith.negf %97 : vector<2x128xf32>
    %99 = math.exp %98 : vector<2x128xf32>
    %cst_30 = arith.constant 1.000000e+00 : f32
    %100 = vector.broadcast %cst_30 : f32 to vector<2x128xf32>
    %101 = arith.addf %100, %99 : vector<2x128xf32>
    %102 = arith.divf %100, %101 : vector<2x128xf32>
    %103 = vector.extract_strided_slice %102 {offsets = [0, 0], sizes = [2, 32], strides = [1, 1]} : vector<2x128xf32> to vector<2x32xf32>
    %104 = vector.extract_strided_slice %102 {offsets = [0, 32], sizes = [2, 32], strides = [1, 1]} : vector<2x128xf32> to vector<2x32xf32>
    %105 = vector.extract_strided_slice %102 {offsets = [0, 96], sizes = [2, 32], strides = [1, 1]} : vector<2x128xf32> to vector<2x32xf32>
    %106 = vector.extract_strided_slice %97 {offsets = [0, 64], sizes = [2, 32], strides = [1, 1]} : vector<2x128xf32> to vector<2x32xf32>
    %107 = math.tanh %106 : vector<2x32xf32>
    %108 = arith.mulf %104, %72 : vector<2x32xf32>
    %109 = arith.mulf %103, %107 : vector<2x32xf32>
    %110 = arith.addf %108, %109 : vector<2x32xf32>
    %111 = math.tanh %110 : vector<2x32xf32>
    %112 = arith.mulf %105, %111 : vector<2x32xf32>
    %113 = tpu.concatenate %112, %92 in 1 : vector<2x32xf32>, vector<2x32xf32> -> vector<2x64xf32>
    %cst_31 = arith.constant dense<0.000000e+00> : vector<2x128xf32>
    %114 = tpu.matmul %113, %1, %cst_31 {dimension_numbers = #tpu.dot_dimension_numbers<[1], [0], [0], [1], [0, 0, 1, 1], [], []>} : vector<2x64xf32>, vector<64x128xf32>, vector<2x128xf32> -> vector<2x128xf32>
    %115 = arith.addf %114, %15 : vector<2x128xf32>
    %116 = arith.negf %115 : vector<2x128xf32>
    %117 = math.exp %116 : vector<2x128xf32>
    %cst_32 = arith.constant 1.000000e+00 : f32
    %118 = vector.broadcast %cst_32 : f32 to vector<2x128xf32>
    %119 = arith.addf %118, %117 : vector<2x128xf32>
    %120 = arith.divf %118, %119 : vector<2x128xf32>
    %121 = vector.extract_strided_slice %120 {offsets = [0, 0], sizes = [2, 32], strides = [1, 1]} : vector<2x128xf32> to vector<2x32xf32>
    %122 = vector.extract_strided_slice %120 {offsets = [0, 32], sizes = [2, 32], strides = [1, 1]} : vector<2x128xf32> to vector<2x32xf32>
    %123 = vector.extract_strided_slice %120 {offsets = [0, 96], sizes = [2, 32], strides = [1, 1]} : vector<2x128xf32> to vector<2x32xf32>
    %124 = vector.extract_strided_slice %115 {offsets = [0, 64], sizes = [2, 32], strides = [1, 1]} : vector<2x128xf32> to vector<2x32xf32>
    %125 = math.tanh %124 : vector<2x32xf32>
    %126 = arith.mulf %122, %90 : vector<2x32xf32>
    %127 = arith.mulf %121, %125 : vector<2x32xf32>
    %128 = arith.addf %126, %127 : vector<2x32xf32>
    %129 = math.tanh %128 : vector<2x32xf32>
    %130 = arith.mulf %123, %129 : vector<2x32xf32>
    %c3_i32 = arith.constant 3 : i32
    %131 = arith.index_cast %c3_i32 : i32 to index
    %c0_33 = arith.constant 0 : index
    %c0_34 = arith.constant 0 : index
    %132 = vector.load %arg9[%131, %c0_33, %c0_34] : memref<8x2x128xf32, #tpu.memory_space<vmem>>, vector<1x2x128xf32>
    %133 = vector.shape_cast %132 : vector<1x2x128xf32> to vector<2x128xf32>
    %cst_35 = arith.constant dense<0.000000e+00> : vector<2x128xf32>
    %134 = tpu.matmul %112, %0, %cst_35 {dimension_numbers = #tpu.dot_dimension_numbers<[1], [0], [0], [1], [0, 0, 1, 1], [], []>} : vector<2x32xf32>, vector<32x128xf32>, vector<2x128xf32> -> vector<2x128xf32>
    %135 = arith.addf %133, %134 : vector<2x128xf32>
    %136 = arith.negf %135 : vector<2x128xf32>
    %137 = math.exp %136 : vector<2x128xf32>
    %cst_36 = arith.constant 1.000000e+00 : f32
    %138 = vector.broadcast %cst_36 : f32 to vector<2x128xf32>
    %139 = arith.addf %138, %137 : vector<2x128xf32>
    %140 = arith.divf %138, %139 : vector<2x128xf32>
    %141 = vector.extract_strided_slice %140 {offsets = [0, 0], sizes = [2, 32], strides = [1, 1]} : vector<2x128xf32> to vector<2x32xf32>
    %142 = vector.extract_strided_slice %140 {offsets = [0, 32], sizes = [2, 32], strides = [1, 1]} : vector<2x128xf32> to vector<2x32xf32>
    %143 = vector.extract_strided_slice %140 {offsets = [0, 96], sizes = [2, 32], strides = [1, 1]} : vector<2x128xf32> to vector<2x32xf32>
    %144 = vector.extract_strided_slice %135 {offsets = [0, 64], sizes = [2, 32], strides = [1, 1]} : vector<2x128xf32> to vector<2x32xf32>
    %145 = math.tanh %144 : vector<2x32xf32>
    %146 = arith.mulf %142, %110 : vector<2x32xf32>
    %147 = arith.mulf %141, %145 : vector<2x32xf32>
    %148 = arith.addf %146, %147 : vector<2x32xf32>
    %149 = math.tanh %148 : vector<2x32xf32>
    %150 = arith.mulf %143, %149 : vector<2x32xf32>
    %151 = tpu.concatenate %150, %130 in 1 : vector<2x32xf32>, vector<2x32xf32> -> vector<2x64xf32>
    %cst_37 = arith.constant dense<0.000000e+00> : vector<2x128xf32>
    %152 = tpu.matmul %151, %1, %cst_37 {dimension_numbers = #tpu.dot_dimension_numbers<[1], [0], [0], [1], [0, 0, 1, 1], [], []>} : vector<2x64xf32>, vector<64x128xf32>, vector<2x128xf32> -> vector<2x128xf32>
    %153 = arith.addf %152, %15 : vector<2x128xf32>
    %154 = arith.negf %153 : vector<2x128xf32>
    %155 = math.exp %154 : vector<2x128xf32>
    %cst_38 = arith.constant 1.000000e+00 : f32
    %156 = vector.broadcast %cst_38 : f32 to vector<2x128xf32>
    %157 = arith.addf %156, %155 : vector<2x128xf32>
    %158 = arith.divf %156, %157 : vector<2x128xf32>
    %159 = vector.extract_strided_slice %158 {offsets = [0, 0], sizes = [2, 32], strides = [1, 1]} : vector<2x128xf32> to vector<2x32xf32>
    %160 = vector.extract_strided_slice %158 {offsets = [0, 32], sizes = [2, 32], strides = [1, 1]} : vector<2x128xf32> to vector<2x32xf32>
    %161 = vector.extract_strided_slice %158 {offsets = [0, 96], sizes = [2, 32], strides = [1, 1]} : vector<2x128xf32> to vector<2x32xf32>
    %162 = vector.extract_strided_slice %153 {offsets = [0, 64], sizes = [2, 32], strides = [1, 1]} : vector<2x128xf32> to vector<2x32xf32>
    %163 = math.tanh %162 : vector<2x32xf32>
    %164 = arith.mulf %160, %128 : vector<2x32xf32>
    %165 = arith.mulf %159, %163 : vector<2x32xf32>
    %166 = arith.addf %164, %165 : vector<2x32xf32>
    %167 = math.tanh %166 : vector<2x32xf32>
    %168 = arith.mulf %161, %167 : vector<2x32xf32>
    %c4_i32 = arith.constant 4 : i32
    %169 = arith.index_cast %c4_i32 : i32 to index
    %c0_39 = arith.constant 0 : index
    %c0_40 = arith.constant 0 : index
    %170 = vector.load %arg9[%169, %c0_39, %c0_40] : memref<8x2x128xf32, #tpu.memory_space<vmem>>, vector<1x2x128xf32>
    %171 = vector.shape_cast %170 : vector<1x2x128xf32> to vector<2x128xf32>
    %cst_41 = arith.constant dense<0.000000e+00> : vector<2x128xf32>
    %172 = tpu.matmul %150, %0, %cst_41 {dimension_numbers = #tpu.dot_dimension_numbers<[1], [0], [0], [1], [0, 0, 1, 1], [], []>} : vector<2x32xf32>, vector<32x128xf32>, vector<2x128xf32> -> vector<2x128xf32>
    %173 = arith.addf %171, %172 : vector<2x128xf32>
    %174 = arith.negf %173 : vector<2x128xf32>
    %175 = math.exp %174 : vector<2x128xf32>
    %cst_42 = arith.constant 1.000000e+00 : f32
    %176 = vector.broadcast %cst_42 : f32 to vector<2x128xf32>
    %177 = arith.addf %176, %175 : vector<2x128xf32>
    %178 = arith.divf %176, %177 : vector<2x128xf32>
    %179 = vector.extract_strided_slice %178 {offsets = [0, 0], sizes = [2, 32], strides = [1, 1]} : vector<2x128xf32> to vector<2x32xf32>
    %180 = vector.extract_strided_slice %178 {offsets = [0, 32], sizes = [2, 32], strides = [1, 1]} : vector<2x128xf32> to vector<2x32xf32>
    %181 = vector.extract_strided_slice %178 {offsets = [0, 96], sizes = [2, 32], strides = [1, 1]} : vector<2x128xf32> to vector<2x32xf32>
    %182 = vector.extract_strided_slice %173 {offsets = [0, 64], sizes = [2, 32], strides = [1, 1]} : vector<2x128xf32> to vector<2x32xf32>
    %183 = math.tanh %182 : vector<2x32xf32>
    %184 = arith.mulf %180, %148 : vector<2x32xf32>
    %185 = arith.mulf %179, %183 : vector<2x32xf32>
    %186 = arith.addf %184, %185 : vector<2x32xf32>
    %187 = math.tanh %186 : vector<2x32xf32>
    %188 = arith.mulf %181, %187 : vector<2x32xf32>
    %189 = tpu.concatenate %188, %168 in 1 : vector<2x32xf32>, vector<2x32xf32> -> vector<2x64xf32>
    %cst_43 = arith.constant dense<0.000000e+00> : vector<2x128xf32>
    %190 = tpu.matmul %189, %1, %cst_43 {dimension_numbers = #tpu.dot_dimension_numbers<[1], [0], [0], [1], [0, 0, 1, 1], [], []>} : vector<2x64xf32>, vector<64x128xf32>, vector<2x128xf32> -> vector<2x128xf32>
    %191 = arith.addf %190, %15 : vector<2x128xf32>
    %192 = arith.negf %191 : vector<2x128xf32>
    %193 = math.exp %192 : vector<2x128xf32>
    %cst_44 = arith.constant 1.000000e+00 : f32
    %194 = vector.broadcast %cst_44 : f32 to vector<2x128xf32>
    %195 = arith.addf %194, %193 : vector<2x128xf32>
    %196 = arith.divf %194, %195 : vector<2x128xf32>
    %197 = vector.extract_strided_slice %196 {offsets = [0, 0], sizes = [2, 32], strides = [1, 1]} : vector<2x128xf32> to vector<2x32xf32>
    %198 = vector.extract_strided_slice %196 {offsets = [0, 32], sizes = [2, 32], strides = [1, 1]} : vector<2x128xf32> to vector<2x32xf32>
    %199 = vector.extract_strided_slice %196 {offsets = [0, 96], sizes = [2, 32], strides = [1, 1]} : vector<2x128xf32> to vector<2x32xf32>
    %200 = vector.extract_strided_slice %191 {offsets = [0, 64], sizes = [2, 32], strides = [1, 1]} : vector<2x128xf32> to vector<2x32xf32>
    %201 = math.tanh %200 : vector<2x32xf32>
    %202 = arith.mulf %198, %166 : vector<2x32xf32>
    %203 = arith.mulf %197, %201 : vector<2x32xf32>
    %204 = arith.addf %202, %203 : vector<2x32xf32>
    %205 = math.tanh %204 : vector<2x32xf32>
    %206 = arith.mulf %199, %205 : vector<2x32xf32>
    %c5_i32 = arith.constant 5 : i32
    %207 = arith.index_cast %c5_i32 : i32 to index
    %c0_45 = arith.constant 0 : index
    %c0_46 = arith.constant 0 : index
    %208 = vector.load %arg9[%207, %c0_45, %c0_46] : memref<8x2x128xf32, #tpu.memory_space<vmem>>, vector<1x2x128xf32>
    %209 = vector.shape_cast %208 : vector<1x2x128xf32> to vector<2x128xf32>
    %cst_47 = arith.constant dense<0.000000e+00> : vector<2x128xf32>
    %210 = tpu.matmul %188, %0, %cst_47 {dimension_numbers = #tpu.dot_dimension_numbers<[1], [0], [0], [1], [0, 0, 1, 1], [], []>} : vector<2x32xf32>, vector<32x128xf32>, vector<2x128xf32> -> vector<2x128xf32>
    %211 = arith.addf %209, %210 : vector<2x128xf32>
    %212 = arith.negf %211 : vector<2x128xf32>
    %213 = math.exp %212 : vector<2x128xf32>
    %cst_48 = arith.constant 1.000000e+00 : f32
    %214 = vector.broadcast %cst_48 : f32 to vector<2x128xf32>
    %215 = arith.addf %214, %213 : vector<2x128xf32>
    %216 = arith.divf %214, %215 : vector<2x128xf32>
    %217 = vector.extract_strided_slice %216 {offsets = [0, 0], sizes = [2, 32], strides = [1, 1]} : vector<2x128xf32> to vector<2x32xf32>
    %218 = vector.extract_strided_slice %216 {offsets = [0, 32], sizes = [2, 32], strides = [1, 1]} : vector<2x128xf32> to vector<2x32xf32>
    %219 = vector.extract_strided_slice %216 {offsets = [0, 96], sizes = [2, 32], strides = [1, 1]} : vector<2x128xf32> to vector<2x32xf32>
    %220 = vector.extract_strided_slice %211 {offsets = [0, 64], sizes = [2, 32], strides = [1, 1]} : vector<2x128xf32> to vector<2x32xf32>
    %221 = math.tanh %220 : vector<2x32xf32>
    %222 = arith.mulf %218, %186 : vector<2x32xf32>
    %223 = arith.mulf %217, %221 : vector<2x32xf32>
    %224 = arith.addf %222, %223 : vector<2x32xf32>
    %225 = math.tanh %224 : vector<2x32xf32>
    %226 = arith.mulf %219, %225 : vector<2x32xf32>
    %227 = tpu.concatenate %226, %206 in 1 : vector<2x32xf32>, vector<2x32xf32> -> vector<2x64xf32>
    %cst_49 = arith.constant dense<0.000000e+00> : vector<2x128xf32>
    %228 = tpu.matmul %227, %1, %cst_49 {dimension_numbers = #tpu.dot_dimension_numbers<[1], [0], [0], [1], [0, 0, 1, 1], [], []>} : vector<2x64xf32>, vector<64x128xf32>, vector<2x128xf32> -> vector<2x128xf32>
    %229 = arith.addf %228, %15 : vector<2x128xf32>
    %230 = arith.negf %229 : vector<2x128xf32>
    %231 = math.exp %230 : vector<2x128xf32>
    %cst_50 = arith.constant 1.000000e+00 : f32
    %232 = vector.broadcast %cst_50 : f32 to vector<2x128xf32>
    %233 = arith.addf %232, %231 : vector<2x128xf32>
    %234 = arith.divf %232, %233 : vector<2x128xf32>
    %235 = vector.extract_strided_slice %234 {offsets = [0, 0], sizes = [2, 32], strides = [1, 1]} : vector<2x128xf32> to vector<2x32xf32>
    %236 = vector.extract_strided_slice %234 {offsets = [0, 32], sizes = [2, 32], strides = [1, 1]} : vector<2x128xf32> to vector<2x32xf32>
    %237 = vector.extract_strided_slice %234 {offsets = [0, 96], sizes = [2, 32], strides = [1, 1]} : vector<2x128xf32> to vector<2x32xf32>
    %238 = vector.extract_strided_slice %229 {offsets = [0, 64], sizes = [2, 32], strides = [1, 1]} : vector<2x128xf32> to vector<2x32xf32>
    %239 = math.tanh %238 : vector<2x32xf32>
    %240 = arith.mulf %236, %204 : vector<2x32xf32>
    %241 = arith.mulf %235, %239 : vector<2x32xf32>
    %242 = arith.addf %240, %241 : vector<2x32xf32>
    %243 = math.tanh %242 : vector<2x32xf32>
    %244 = arith.mulf %237, %243 : vector<2x32xf32>
    %c6_i32 = arith.constant 6 : i32
    %245 = arith.index_cast %c6_i32 : i32 to index
    %c0_51 = arith.constant 0 : index
    %c0_52 = arith.constant 0 : index
    %246 = vector.load %arg9[%245, %c0_51, %c0_52] : memref<8x2x128xf32, #tpu.memory_space<vmem>>, vector<1x2x128xf32>
    %247 = vector.shape_cast %246 : vector<1x2x128xf32> to vector<2x128xf32>
    %cst_53 = arith.constant dense<0.000000e+00> : vector<2x128xf32>
    %248 = tpu.matmul %226, %0, %cst_53 {dimension_numbers = #tpu.dot_dimension_numbers<[1], [0], [0], [1], [0, 0, 1, 1], [], []>} : vector<2x32xf32>, vector<32x128xf32>, vector<2x128xf32> -> vector<2x128xf32>
    %249 = arith.addf %247, %248 : vector<2x128xf32>
    %250 = arith.negf %249 : vector<2x128xf32>
    %251 = math.exp %250 : vector<2x128xf32>
    %cst_54 = arith.constant 1.000000e+00 : f32
    %252 = vector.broadcast %cst_54 : f32 to vector<2x128xf32>
    %253 = arith.addf %252, %251 : vector<2x128xf32>
    %254 = arith.divf %252, %253 : vector<2x128xf32>
    %255 = vector.extract_strided_slice %254 {offsets = [0, 0], sizes = [2, 32], strides = [1, 1]} : vector<2x128xf32> to vector<2x32xf32>
    %256 = vector.extract_strided_slice %254 {offsets = [0, 32], sizes = [2, 32], strides = [1, 1]} : vector<2x128xf32> to vector<2x32xf32>
    %257 = vector.extract_strided_slice %254 {offsets = [0, 96], sizes = [2, 32], strides = [1, 1]} : vector<2x128xf32> to vector<2x32xf32>
    %258 = vector.extract_strided_slice %249 {offsets = [0, 64], sizes = [2, 32], strides = [1, 1]} : vector<2x128xf32> to vector<2x32xf32>
    %259 = math.tanh %258 : vector<2x32xf32>
    %260 = arith.mulf %256, %224 : vector<2x32xf32>
    %261 = arith.mulf %255, %259 : vector<2x32xf32>
    %262 = arith.addf %260, %261 : vector<2x32xf32>
    %263 = math.tanh %262 : vector<2x32xf32>
    %264 = arith.mulf %257, %263 : vector<2x32xf32>
    %265 = tpu.concatenate %264, %244 in 1 : vector<2x32xf32>, vector<2x32xf32> -> vector<2x64xf32>
    %cst_55 = arith.constant dense<0.000000e+00> : vector<2x128xf32>
    %266 = tpu.matmul %265, %1, %cst_55 {dimension_numbers = #tpu.dot_dimension_numbers<[1], [0], [0], [1], [0, 0, 1, 1], [], []>} : vector<2x64xf32>, vector<64x128xf32>, vector<2x128xf32> -> vector<2x128xf32>
    %267 = arith.addf %266, %15 : vector<2x128xf32>
    %268 = arith.negf %267 : vector<2x128xf32>
    %269 = math.exp %268 : vector<2x128xf32>
    %cst_56 = arith.constant 1.000000e+00 : f32
    %270 = vector.broadcast %cst_56 : f32 to vector<2x128xf32>
    %271 = arith.addf %270, %269 : vector<2x128xf32>
    %272 = arith.divf %270, %271 : vector<2x128xf32>
    %273 = vector.extract_strided_slice %272 {offsets = [0, 0], sizes = [2, 32], strides = [1, 1]} : vector<2x128xf32> to vector<2x32xf32>
    %274 = vector.extract_strided_slice %272 {offsets = [0, 32], sizes = [2, 32], strides = [1, 1]} : vector<2x128xf32> to vector<2x32xf32>
    %275 = vector.extract_strided_slice %272 {offsets = [0, 96], sizes = [2, 32], strides = [1, 1]} : vector<2x128xf32> to vector<2x32xf32>
    %276 = vector.extract_strided_slice %267 {offsets = [0, 64], sizes = [2, 32], strides = [1, 1]} : vector<2x128xf32> to vector<2x32xf32>
    %277 = math.tanh %276 : vector<2x32xf32>
    %278 = arith.mulf %274, %242 : vector<2x32xf32>
    %279 = arith.mulf %273, %277 : vector<2x32xf32>
    %280 = arith.addf %278, %279 : vector<2x32xf32>
    %281 = math.tanh %280 : vector<2x32xf32>
    %282 = arith.mulf %275, %281 : vector<2x32xf32>
    %c7_i32 = arith.constant 7 : i32
    %283 = arith.index_cast %c7_i32 : i32 to index
    %c0_57 = arith.constant 0 : index
    %c0_58 = arith.constant 0 : index
    %284 = vector.load %arg9[%283, %c0_57, %c0_58] : memref<8x2x128xf32, #tpu.memory_space<vmem>>, vector<1x2x128xf32>
    %285 = vector.shape_cast %284 : vector<1x2x128xf32> to vector<2x128xf32>
    %cst_59 = arith.constant dense<0.000000e+00> : vector<2x128xf32>
    %286 = tpu.matmul %264, %0, %cst_59 {dimension_numbers = #tpu.dot_dimension_numbers<[1], [0], [0], [1], [0, 0, 1, 1], [], []>} : vector<2x32xf32>, vector<32x128xf32>, vector<2x128xf32> -> vector<2x128xf32>
    %287 = arith.addf %285, %286 : vector<2x128xf32>
    %288 = arith.negf %287 : vector<2x128xf32>
    %289 = math.exp %288 : vector<2x128xf32>
    %cst_60 = arith.constant 1.000000e+00 : f32
    %290 = vector.broadcast %cst_60 : f32 to vector<2x128xf32>
    %291 = arith.addf %290, %289 : vector<2x128xf32>
    %292 = arith.divf %290, %291 : vector<2x128xf32>
    %293 = vector.extract_strided_slice %292 {offsets = [0, 0], sizes = [2, 32], strides = [1, 1]} : vector<2x128xf32> to vector<2x32xf32>
    %294 = vector.extract_strided_slice %292 {offsets = [0, 32], sizes = [2, 32], strides = [1, 1]} : vector<2x128xf32> to vector<2x32xf32>
    %295 = vector.extract_strided_slice %292 {offsets = [0, 96], sizes = [2, 32], strides = [1, 1]} : vector<2x128xf32> to vector<2x32xf32>
    %296 = vector.extract_strided_slice %287 {offsets = [0, 64], sizes = [2, 32], strides = [1, 1]} : vector<2x128xf32> to vector<2x32xf32>
    %297 = math.tanh %296 : vector<2x32xf32>
    %298 = arith.mulf %294, %262 : vector<2x32xf32>
    %299 = arith.mulf %293, %297 : vector<2x32xf32>
    %300 = arith.addf %298, %299 : vector<2x32xf32>
    %301 = math.tanh %300 : vector<2x32xf32>
    %302 = arith.mulf %295, %301 : vector<2x32xf32>
    %303 = tpu.concatenate %302, %282 in 1 : vector<2x32xf32>, vector<2x32xf32> -> vector<2x64xf32>
    %cst_61 = arith.constant dense<0.000000e+00> : vector<2x128xf32>
    %304 = tpu.matmul %303, %1, %cst_61 {dimension_numbers = #tpu.dot_dimension_numbers<[1], [0], [0], [1], [0, 0, 1, 1], [], []>} : vector<2x64xf32>, vector<64x128xf32>, vector<2x128xf32> -> vector<2x128xf32>
    %305 = arith.addf %304, %15 : vector<2x128xf32>
    %306 = arith.negf %305 : vector<2x128xf32>
    %307 = math.exp %306 : vector<2x128xf32>
    %cst_62 = arith.constant 1.000000e+00 : f32
    %308 = vector.broadcast %cst_62 : f32 to vector<2x128xf32>
    %309 = arith.addf %308, %307 : vector<2x128xf32>
    %310 = arith.divf %308, %309 : vector<2x128xf32>
    %311 = vector.extract_strided_slice %310 {offsets = [0, 0], sizes = [2, 32], strides = [1, 1]} : vector<2x128xf32> to vector<2x32xf32>
    %312 = vector.extract_strided_slice %310 {offsets = [0, 32], sizes = [2, 32], strides = [1, 1]} : vector<2x128xf32> to vector<2x32xf32>
    %313 = vector.extract_strided_slice %310 {offsets = [0, 96], sizes = [2, 32], strides = [1, 1]} : vector<2x128xf32> to vector<2x32xf32>
    %314 = vector.extract_strided_slice %305 {offsets = [0, 64], sizes = [2, 32], strides = [1, 1]} : vector<2x128xf32> to vector<2x32xf32>
    %315 = math.tanh %314 : vector<2x32xf32>
    %316 = arith.mulf %312, %280 : vector<2x32xf32>
    %317 = arith.mulf %311, %315 : vector<2x32xf32>
    %318 = arith.addf %316, %317 : vector<2x32xf32>
    %319 = math.tanh %318 : vector<2x32xf32>
    %320 = arith.mulf %313, %319 : vector<2x32xf32>
    %c8_i32 = arith.constant 8 : i32
    %c0_63 = arith.constant 0 : index
    %c0_64 = arith.constant 0 : index
    %321 = vector.load %arg6[%c0_63, %c0_64] : memref<32x1xf32, #tpu.memory_space<vmem>>, vector<32x1xf32>
    %cst_65 = arith.constant dense<0.000000e+00> : vector<2x1xf32>
    %322 = tpu.matmul %320, %321, %cst_65 {dimension_numbers = #tpu.dot_dimension_numbers<[1], [0], [0], [1], [0, 0, 1, 1], [], []>} : vector<2x32xf32>, vector<32x1xf32>, vector<2x1xf32> -> vector<2x1xf32>
    %c0_66 = arith.constant 0 : index
    %c0_67 = arith.constant 0 : index
    %323 = vector.load %arg7[%c0_66, %c0_67] : memref<1x1xf32, #tpu.memory_space<vmem>>, vector<1x1xf32>
    %324 = vector.broadcast %323 : vector<1x1xf32> to vector<2x1xf32>
    %325 = arith.addf %322, %324 : vector<2x1xf32>
    %c0_68 = arith.constant 0 : index
    %c0_69 = arith.constant 0 : index
    %326 = vector.load %arg8[%c0_68, %c0_69] : memref<2x1xf32, #tpu.memory_space<vmem>>, vector<2x1xf32>
    tpu.vector_store %arg8[%c0_68, %c0_69], %325 {strides = array<i32>} : memref<2x1xf32, #tpu.memory_space<vmem>>, vector<2x1xf32>,
    return
  }
}

</mosaic_0001>

<bundles_post_ra>
// kernel: lstm_model_forward.1
= control target key start
LH: loop header
LB: loop body
LE: loop exit
PB: predicated region body
PF: predicated region fallthrough
CT: control target
= control target key end

     0   :  { %s3015_s0 = inlined_call_operand.vmem [shape: f32[8,2,1], index: 0, kind: input, shape index: {}]   ;;  %s3016_s1 = inlined_call_operand.vmem [shape: f32[1,128], index: 1, kind: input, shape index: {}]   ;;  %s3017_s2 = inlined_call_operand.vmem [shape: f32[32,128], index: 2, kind: input, shape index: {}]   ;;  %s3018_s3 = inlined_call_operand.vmem [shape: f32[1,128], index: 3, kind: input, shape index: {}]   ;;  %s3019_s4 = inlined_call_operand.hbm [shape: f32[64,128], index: 4, kind: input, shape index: {}]   ;;  %s3020_s5 = inlined_call_operand.vmem [shape: f32[1,128], index: 5, kind: input, shape index: {}]   ;;  %s3021_s6 = inlined_call_operand.vmem [shape: f32[32,1], index: 6, kind: input, shape index: {}]   ;;  %s3022_s7 = inlined_call_operand.<no memory space> [shape: f32[1,1], index: 7, kind: input, shape index: {}]   ;;  %s3023_s8 = inlined_call_operand.vmem [shape: f32[2,1], index: 8, kind: output, shape index: {}]  }
   0x1   :  { %v13_v0 = vstv %s3022_s7 }
   0x2   :  { %14 = vst [vmem:[#allocation3] sm:$0x1] %v13_v0 }
   0x3   :  { %15 = vsyncpa [#allocation5], 0  ;;  %s2460_s29 = smov [#allocation4]  }
   0x4   :  { %s29_s30 = sshll.u32 %s2460_s29, 4  ;;  %s30_s30 = int_to_ptr.vmem [resolvable:$true] %s29_s30 }
   0x5   :  { %s2446_s9 = scalar_lea.vmem %s30_s30, 1024  ;;  %p2451_p1 = scmp.lt.s32.totalorder %s30_s30, %s30_s30 }
   0x6   :  { %p2447_p0 = scmp.ne.s32.totalorder %s30_s30, %s2446_s9  ;;  %p2452_p2 = scmp.lt.s32.totalorder %s2446_s9, %s2446_s9 }
   0x8   :  { %p2453_p3 = por %p2452_p2, %p2451_p1 }
   0xa   :  { %p2454_p4 = pnand %p2453_p3, %p2447_p0 }
   0xc   :  { %2457 = shalt.err (!%p2454_p4)
}
   0xd   :  { %s2461_s10 = smov 128   ;;  %s2462_s11 = smov 8  }
   0xe   :  { %35 = dma.hbm_to_vmem [thread:$0]  %s3019_s4, 1024, %s30_s30, [#allocation5], %s2461_s10, %s2461_s10, %s2462_s11  }
   0xf   :  { %2458 = dma.done.wait [#allocation5], 1024  }
  0x10   :  { %2459 = vsyncadd [#allocation5], 4294966272  ;;  %v2463_v1 = vmov 0.0   ;;  %vm2464_vm0 = vmmov 0   ;;  %v2465_v2 = vmov 0   ;;  %v2528_v3 = vld [vmem:[%s3017_s2 + $0x18] sm:$0xff] }
  0x11   :  { %2034 = vmatprep.subr.mxu0 %v2463_v1  ;;  %2042 = vmatprep.mubr.msk.f32.mxu0 %vm2464_vm0, %v2463_v1  ;;  %v2533_v4 = vld [vmem:[%s3017_s2 + $0x10] sm:$0xff]  ;;  %v57_v5 = vld [vmem:[%s3015_s0] sm:$0x3]  ;;  %v2543_v6 = vld [vmem:[%s3017_s2 + $0x8] sm:$0xff]  ;;  %s2466_s26 = smov 64   ;;  %s2467_s27 = smov 32  }
  0x12   :  { %2293 = vset.pattern.permute.xlu0 %v2465_v2  ;;  %2045 = vmatprep.subr.mxu1 %v2463_v1  ;;  %v2550_v7 = vld [vmem:[%s3017_s2] sm:$0xff]  ;;  %v2584_v27 = vld [vmem:[#allocation4 + $0x38] sm:$0xff]  ;;  %v2594_v30 = vld [vmem:[#allocation4 + $0x20] sm:$0xff]  ;;  %vm151_vm1 = vcmask 261120   ;;  %vm255_vm2 = vcmask 523264   ;;  %vm1874_vm3 = vcmask 1024  }
  0x13   :  { %2061 = vmatprep.mubr.msk.f32.mxu1 %vm2464_vm0, %v2463_v1  ;;  %2294 = vset.pattern.permute.xlu1 %v2465_v2  ;;  %v2570_v8 = vld [vmem:[%s3016_s1] ss:$0 sm:$0xff]  ;;  %v2586_v28 = vld [vmem:[#allocation4 + $0x30] sm:$0xff]  ;;  %v2598_v31 = vld [vmem:[#allocation4 + $0x18] sm:$0xff] }
  0x14   :  { %2035 = vmatpush3.msra.mxu0 %v2528_v3  ;;  %68 = vperm.xlu0 %2293, %v57_v5   ;;  %v2575_v9 = vld [vmem:[%s3018_s3] ss:$0 sm:$0xff]  ;;  %v2602_v32 = vld [vmem:[#allocation4 + $0x10] sm:$0xff]  ;;  %v2613_v35 = vld [vmem:[#allocation4] sm:$0xff] }
  0x15   :  { %2036 = vmatprep.subr.mxu0 %v2463_v1  ;;  %2046 = vmatpush3.msra.mxu1 %v2584_v27  ;;  %v2590_v29 = vld [vmem:[#allocation4 + $0x28] sm:$0xff]  ;;  %v58_v36 = vld [vmem:[%s3015_s0 + $0x2] sm:$0x3] }
  0x16   :  { %2037 = vmatpush3.msra.mxu0 %v2533_v4  ;;  %2047 = vmatprep.subr.mxu1 %v2463_v1  ;;  %v2606_v34 = vld [vmem:[#allocation4 + $0x8] sm:$0xff] }
  0x17   :  { %2038 = vmatprep.subr.mxu0 %v2463_v1  ;;  %2048 = vmatpush3.msra.mxu1 %v2586_v28  ;;  %v2657_v45 = vld [vmem:[%s3020_s5] ss:$0 sm:$0xff] }
  0x18   :  { %2039 = vmatpush3.msra.mxu0 %v2543_v6  ;;  %2049 = vmatprep.subr.mxu1 %v2463_v1 }
  0x19   :  { %2040 = vmatprep.subr.mxu0 %v2463_v1  ;;  %2050 = vmatpush3.msra.mxu1 %v2590_v29 }
  0x1a   :  { %2041 = vmatpush3.msra.mxu0 %v2550_v7  ;;  %2051 = vmatprep.subr.mxu1 %v2463_v1 }
  0x1b   :  { %2043 = vmatmul.mubr.f32.vlgmr.msra.gmra.mxu0 %v2463_v1  ;;  %2064 = vmatprep.subr.mxu0 %v2463_v1 }
  0x1c   :  { %2065 = vmatpush3.msra.mxu0 %v2528_v3  ;;  %2072 = vmatprep.mubr.msk.f32.mxu0 %vm2464_vm0, %v2463_v1 }
  0x1d   :  { %2066 = vmatprep.subr.mxu0 %v2463_v1  ;;  %2052 = vmatpush3.msra.mxu1 %v2594_v30 }
  0x1e   :  { %2067 = vmatpush3.msra.mxu0 %v2533_v4  ;;  %2053 = vmatprep.subr.mxu1 %v2463_v1 }
  0x1f   :  { %2068 = vmatprep.subr.mxu0 %v2463_v1  ;;  %2054 = vmatpush3.msra.mxu1 %v2598_v31 }
  0x20   :  { %2069 = vmatpush3.msra.mxu0 %v2543_v6  ;;  %2055 = vmatprep.subr.mxu1 %v2463_v1 }
  0x21   :  { %2070 = vmatprep.subr.mxu0 %v2463_v1  ;;  %2056 = vmatpush3.msra.mxu1 %v2602_v32 }
  0x22   :  { %2071 = vmatpush3.msra.mxu0 %v2550_v7  ;;  %2057 = vmatprep.subr.mxu1 %v2463_v1 }
  0x23   :  { %2075 = vmatprep.subr.mxu0 %v2463_v1  ;;  %2058 = vmatpush3.msra.mxu1 %v2606_v34 }
  0x24   :  { %2059 = vmatprep.subr.mxu1 %v2463_v1 }
  0x25   :  { %2060 = vmatpush3.msra.mxu1 %v2613_v35 }
  0x26   :  { %2094 = vmatprep.subr.mxu1 %v2463_v1 }
  0x8f   :  { %v69_v10 = vpop.permute.xlu0 %68 }
  0x90   :  { %v112_v11 = vmul.f32 %v2570_v8, %v69_v10 }
  0x92   :  { %v127_v12 = vadd.f32 %v2575_v9, %v112_v11 }
  0x94   :  { %135 = vst [vmem:[#allocation2] sm:$0x3] %v127_v12 }
  0x9b   :  { %v150_v13 = vld [vmem:[#allocation2] sm:$0x3] }
  0xdb   :  { %v221_v14 = vpop.f32.mrf.mxu0 }
  0xdc   :  { %v225_v15 = vadd.f32 %v221_v14, %v150_v13 }
  0xdd   :  { %v2044_v16 = vpop.f32.mrf.mxu0 }
  0xde   :  { %2295 = vtanh.f32 %v225_v15  ;;  %v1884_v18 = vmul.f32 -1.442695, %v225_v15 }
  0xe0   :  { %2297 = vpow2.f32 %v1884_v18 }
  0xeb   :  { %v2296_v17 = vpop.eup %2295 }
  0xec   :  { %235 = vrot.lane.b32.xlu0 %v2296_v17, %s2466_s26 }
  0xed   :  { %v2298_v19 = vpop.eup %2297 }
  0xee   :  { %v229_v20 = vadd.f32 1.0, %v2298_v19 }
  0xf0   :  { %2299 = vrcp.f32 %v229_v20 }
  0xfd   :  { %v2300_v21 = vpop.eup %2299 }
  0xfe   :  { %v233_v24 = vmul.f32 0.0, %v2300_v21 }
 0x15e   :  { %v236_v22 = vpop.permute.xlu0 %235 }
 0x15f   :  { %v238_v23 = vmul.f32 %v2300_v21, %v236_v22 }
 0x161   :  { %240 = vrot.lane.b32.xlu1 %v238_v23, %s2467_s27 }
 0x1d3   :  { %v241_v25 = vpop.permute.xlu1 %240 }
 0x1d4   :  { %v2581_v26 = vadd.f32 %v241_v25, %v233_v24 }
 0x1d6   :  { %2301 = vtanh.f32 %v2581_v26 }
 0x1e3   :  { %v2302_v33 = vpop.eup %2301 }
 0x1e4   :  { %246 = vrot.lane.b32.xlu1 %v2302_v33, %s2466_s26 }
 0x1e8   :  { %73 = vperm.xlu1 %2294, %v58_v36  }
 0x256   :  { %v247_v37 = vpop.permute.xlu1 %246 }
 0x257   :  { %v249_v38 = vmul.f32 %v2300_v21, %v247_v37  ;;  %v59_v21 = vld [vmem:[%s3015_s0 + $0x4] sm:$0x3] }
 0x259   :  { %251 = vrot.lane.b32.xlu0 %v249_v38, %s2467_s27 }
 0x263   :  { %v74_v39 = vpop.permute.xlu1 %73 }
 0x264   :  { %v113_v40 = vmul.f32 %v2570_v8, %v74_v39 }
 0x266   :  { %v128_v43 = vadd.f32 %v2575_v9, %v113_v40 }
 0x268   :  { %136 = vst [vmem:[#allocation2 + $0x2] sm:$0x3] %v128_v43 }
 0x26f   :  { %v354_v44 = vld [vmem:[#allocation2 + $0x2] sm:$0x3] }
 0x2cb   :  { %v252_v41 = vpop.permute.xlu0 %251 }
 0x2cc   :  { %v254_v42 = vsel %vm151_vm1, %v252_v41, 0.0  ;;  %2073 = vmatmul.mubr.msk.f32.vlgmr.msra.gmra.mxu0 %vm151_vm1, %v252_v41 }
 0x2cd   :  { %2062 = vmatmul.mubr.msk.f32.vlgmr.msra.gmra.mxu1 %vm255_vm2, %v254_v42  ;;  %2076 = vmatpush3.msra.mxu0 %v2584_v27 }
 0x2ce   :  { %2077 = vmatprep.subr.mxu0 %v2463_v1  ;;  %2095 = vmatpush3.msra.mxu1 %v2528_v3 }
 0x2cf   :  { %2078 = vmatpush3.msra.mxu0 %v2586_v28  ;;  %2096 = vmatprep.subr.mxu1 %v2463_v1 }
 0x2d0   :  { %2079 = vmatprep.subr.mxu0 %v2463_v1  ;;  %2097 = vmatpush3.msra.mxu1 %v2533_v4 }
 0x2d1   :  { %2080 = vmatpush3.msra.mxu0 %v2590_v29  ;;  %2098 = vmatprep.subr.mxu1 %v2463_v1 }
 0x2d2   :  { %2081 = vmatprep.subr.mxu0 %v2463_v1  ;;  %2099 = vmatpush3.msra.mxu1 %v2543_v6 }
 0x2d3   :  { %2082 = vmatpush3.msra.mxu0 %v2594_v30  ;;  %2100 = vmatprep.subr.mxu1 %v2463_v1 }
 0x2d4   :  { %2083 = vmatprep.subr.mxu0 %v2463_v1  ;;  %2101 = vmatpush3.msra.mxu1 %v2550_v7 }
 0x2d5   :  { %2084 = vmatpush3.msra.mxu0 %v2598_v31  ;;  %2102 = vmatprep.mubr.msk.f32.mxu1 %vm2464_vm0, %v2463_v1 }
 0x2d6   :  { %2085 = vmatprep.subr.mxu0 %v2463_v1  ;;  %2091 = vmatprep.mubr.msk.f32.mxu0 %vm2464_vm0, %v2463_v1 }
 0x2d7   :  { %2086 = vmatpush3.msra.mxu0 %v2602_v32  ;;  %2105 = vmatprep.subr.mxu1 %v2463_v1 }
 0x2d8   :  { %2087 = vmatprep.subr.mxu0 %v2463_v1 }
 0x2d9   :  { %2088 = vmatpush3.msra.mxu0 %v2606_v34 }
 0x2da   :  { %2089 = vmatprep.subr.mxu0 %v2463_v1 }
 0x2db   :  { %2090 = vmatpush3.msra.mxu0 %v2613_v35 }
 0x2dc   :  { %2124 = vmatprep.subr.mxu0 %v2463_v1 }
 0x38c   :  { %v423_v46 = vpop.f32.mrf.mxu0 }
 0x38d   :  { %v427_v47 = vadd.f32 %v423_v46, %v354_v44  ;;  %v325_v48 = vpop.f32.mrf.mxu1 }
 0x38e   :  { %v326_v49 = vadd.f32 %v2657_v45, %v325_v48  ;;  %v2074_v50 = vpop.f32.mrf.mxu0 }
 0x38f   :  { %2303 = vtanh.f32 %v427_v47  ;;  %v2063_v51 = vpop.f32.mrf.mxu1  ;;  %v1888_v54 = vmul.f32 -1.442695, %v427_v47 }
 0x390   :  { %2305 = vtanh.f32 %v326_v49  ;;  %v1886_v55 = vmul.f32 -1.442695, %v326_v49 }
 0x391   :  { %2307 = vpow2.f32 %v1888_v54 }
 0x392   :  { %2309 = vpow2.f32 %v1886_v55 }
 0x39c   :  { %v2304_v52 = vpop.eup %2303 }
 0x39d   :  { %v2306_v53 = vpop.eup %2305  ;;  %437 = vrot.lane.b32.xlu1 %v2304_v52, %s2466_s26 }
 0x39e   :  { %338 = vrot.lane.b32.xlu0 %v2306_v53, %s2466_s26  ;;  %v2308_v56 = vpop.eup %2307 }
 0x39f   :  { %v2310_v57 = vpop.eup %2309  ;;  %v431_v58 = vadd.f32 1.0, %v2308_v56 }
 0x3a0   :  { %v332_v59 = vadd.f32 1.0, %v2310_v57 }
 0x3a1   :  { %2311 = vrcp.f32 %v431_v58 }
 0x3a2   :  { %2313 = vrcp.f32 %v332_v59 }
 0x3ae   :  { %v2312_v60 = vpop.eup %2311 }
 0x3af   :  { %v2314_v62 = vpop.eup %2313  ;;  %v435_v5 = vmul.f32 %v2312_v60, %v2581_v26 }
 0x3b0   :  { %v336_v11 = vmul.f32 0.0, %v2314_v62 }
 0x40f   :  { %v438_v61 = vpop.permute.xlu1 %437 }
 0x410   :  { %v440_v63 = vmul.f32 %v2312_v60, %v438_v61  ;;  %v339_v0 = vpop.permute.xlu0 %338 }
 0x411   :  { %v341_v2 = vmul.f32 %v2314_v62, %v339_v0 }
 0x412   :  { %442 = vrot.lane.b32.xlu1 %v440_v63, %s2467_s27 }
 0x413   :  { %343 = vrot.lane.b32.xlu0 %v341_v2, %s2467_s27 }
 0x484   :  { %v443_v10 = vpop.permute.xlu1 %442 }
 0x485   :  { %v2665_v12 = vadd.f32 %v443_v10, %v435_v5  ;;  %v344_v13 = vpop.permute.xlu0 %343 }
 0x486   :  { %v2667_v14 = vadd.f32 %v344_v13, %v336_v11  ;;  %v60_v13 = vld [vmem:[%s3015_s0 + $0x6] sm:$0x3] }
 0x487   :  { %2315 = vtanh.f32 %v2665_v12 }
 0x488   :  { %2317 = vtanh.f32 %v2667_v14 }
 0x494   :  { %v2316_v15 = vpop.eup %2315 }
 0x495   :  { %v2318_v16 = vpop.eup %2317  ;;  %448 = vrot.lane.b32.xlu1 %v2316_v15, %s2466_s26 }
 0x496   :  { %349 = vrot.lane.b32.xlu0 %v2318_v16, %s2466_s26 }
 0x507   :  { %v449_v17 = vpop.permute.xlu1 %448 }
 0x508   :  { %v451_v18 = vmul.f32 %v2312_v60, %v449_v17  ;;  %v350_v19 = vpop.permute.xlu0 %349 }
 0x509   :  { %v352_v20 = vmul.f32 %v2314_v62, %v350_v19 }
 0x50a   :  { %453 = vrot.lane.b32.xlu0 %v451_v18, %s2467_s27 }
 0x50b   :  { %457 = vrot.lane.b32.xlu1 %v352_v20, %s2466_s26 }
 0x50e   :  { %78 = vperm.xlu0 %2293, %v59_v21  }
 0x57c   :  { %v454_v22 = vpop.permute.xlu0 %453 }
 0x57d   :  { %2103 = vmatmul.mubr.msk.f32.vlgmr.msra.gmra.mxu1 %vm151_vm1, %v454_v22  ;;  %v458_v23 = vpop.permute.xlu1 %457 }
 0x57e   :  { %v460_v24 = vsel %vm151_vm1, %v454_v22, %v458_v23  ;;  %2106 = vmatpush3.msra.mxu1 %v2584_v27  ;;  %2121 = vmatprep.mubr.msk.f32.mxu1 %vm2464_vm0, %v2463_v1 }
 0x57f   :  { %2092 = vmatmul.mubr.msk.f32.vlgmr.msra.gmra.mxu0 %vm255_vm2, %v460_v24  ;;  %2107 = vmatprep.subr.mxu1 %v2463_v1 }
 0x580   :  { %2108 = vmatpush3.msra.mxu1 %v2586_v28  ;;  %2125 = vmatpush3.msra.mxu0 %v2528_v3 }
 0x581   :  { %2109 = vmatprep.subr.mxu1 %v2463_v1  ;;  %2126 = vmatprep.subr.mxu0 %v2463_v1 }
 0x582   :  { %2110 = vmatpush3.msra.mxu1 %v2590_v29  ;;  %2127 = vmatpush3.msra.mxu0 %v2533_v4 }
 0x583   :  { %2111 = vmatprep.subr.mxu1 %v2463_v1  ;;  %2128 = vmatprep.subr.mxu0 %v2463_v1 }
 0x584   :  { %2112 = vmatpush3.msra.mxu1 %v2594_v30  ;;  %2129 = vmatpush3.msra.mxu0 %v2543_v6 }
 0x585   :  { %2113 = vmatprep.subr.mxu1 %v2463_v1  ;;  %2130 = vmatprep.subr.mxu0 %v2463_v1 }
 0x586   :  { %2114 = vmatpush3.msra.mxu1 %v2598_v31  ;;  %2131 = vmatpush3.msra.mxu0 %v2550_v7 }
 0x587   :  { %2115 = vmatprep.subr.mxu1 %v2463_v1  ;;  %2132 = vmatprep.mubr.msk.f32.mxu0 %vm2464_vm0, %v2463_v1 }
 0x588   :  { %2116 = vmatpush3.msra.mxu1 %v2602_v32  ;;  %2135 = vmatprep.subr.mxu0 %v2463_v1 }
 0x589   :  { %v79_v25 = vpop.permute.xlu0 %78  ;;  %2117 = vmatprep.subr.mxu1 %v2463_v1 }
 0x58a   :  { %v114_v26 = vmul.f32 %v2570_v8, %v79_v25  ;;  %2118 = vmatpush3.msra.mxu1 %v2606_v34 }
 0x58b   :  { %2119 = vmatprep.subr.mxu1 %v2463_v1 }
 0x58c   :  { %v129_v33 = vadd.f32 %v2575_v9, %v114_v26  ;;  %2120 = vmatpush3.msra.mxu1 %v2613_v35 }
 0x58d   :  { %2154 = vmatprep.subr.mxu1 %v2463_v1 }
 0x58e   :  { %137 = vst [vmem:[#allocation2 + $0x4] sm:$0x3] %v129_v33 }
 0x595   :  { %v559_v36 = vld [vmem:[#allocation2 + $0x4] sm:$0x3] }
 0x63d   :  { %v628_v37 = vpop.f32.mrf.mxu1 }
 0x63e   :  { %v632_v38 = vadd.f32 %v628_v37, %v559_v36 }
 0x63f   :  { %v530_v39 = vpop.f32.mrf.mxu0  ;;  %v2104_v40 = vpop.f32.mrf.mxu1 }
 0x640   :  { %2319 = vtanh.f32 %v632_v38  ;;  %v531_v41 = vadd.f32 %v2657_v45, %v530_v39  ;;  %v1892_v46 = vmul.f32 -1.442695, %v632_v38 }
 0x641   :  { %v2093_v42 = vpop.f32.mrf.mxu0 }
 0x642   :  { %2321 = vtanh.f32 %v531_v41  ;;  %v1890_v47 = vmul.f32 -1.442695, %v531_v41 }
 0x643   :  { %2323 = vpow2.f32 %v1892_v46 }
 0x644   :  { %2325 = vpow2.f32 %v1890_v47 }
 0x64d   :  { %v2320_v43 = vpop.eup %2319 }
 0x64e   :  { %642 = vrot.lane.b32.xlu0 %v2320_v43, %s2466_s26 }
 0x64f   :  { %v2322_v44 = vpop.eup %2321 }
 0x650   :  { %543 = vrot.lane.b32.xlu1 %v2322_v44, %s2466_s26  ;;  %v2324_v48 = vpop.eup %2323 }
 0x651   :  { %v2326_v49 = vpop.eup %2325  ;;  %v636_v50 = vadd.f32 1.0, %v2324_v48 }
 0x652   :  { %v537_v51 = vadd.f32 1.0, %v2326_v49 }
 0x653   :  { %2327 = vrcp.f32 %v636_v50 }
 0x654   :  { %2329 = vrcp.f32 %v537_v51 }
 0x660   :  { %v2328_v52 = vpop.eup %2327 }
 0x661   :  { %v2330_v55 = vpop.eup %2329  ;;  %v640_v58 = vmul.f32 %v2328_v52, %v2665_v12 }
 0x662   :  { %v541_v61 = vmul.f32 %v2330_v55, %v2667_v14 }
 0x6c0   :  { %v643_v53 = vpop.permute.xlu0 %642 }
 0x6c1   :  { %v645_v54 = vmul.f32 %v2328_v52, %v643_v53 }
 0x6c2   :  { %v544_v56 = vpop.permute.xlu1 %543 }
 0x6c3   :  { %647 = vrot.lane.b32.xlu0 %v645_v54, %s2467_s27  ;;  %v546_v57 = vmul.f32 %v2330_v55, %v544_v56 }
 0x6c5   :  { %548 = vrot.lane.b32.xlu1 %v546_v57, %s2467_s27 }
 0x735   :  { %v648_v59 = vpop.permute.xlu0 %647 }
 0x736   :  { %v2717_v60 = vadd.f32 %v648_v59, %v640_v58 }
 0x737   :  { %v549_v62 = vpop.permute.xlu1 %548 }
 0x738   :  { %2331 = vtanh.f32 %v2717_v60  ;;  %v2721_v63 = vadd.f32 %v549_v62, %v541_v61  ;;  %v61_v61 = vld [vmem:[%s3015_s0 + $0x8] sm:$0x3] }
 0x73a   :  { %2333 = vtanh.f32 %v2721_v63 }
 0x745   :  { %v2332_v0 = vpop.eup %2331 }
 0x746   :  { %653 = vrot.lane.b32.xlu0 %v2332_v0, %s2466_s26 }
 0x747   :  { %v2334_v2 = vpop.eup %2333 }
 0x748   :  { %554 = vrot.lane.b32.xlu1 %v2334_v2, %s2466_s26 }
 0x7b8   :  { %v654_v5 = vpop.permute.xlu0 %653 }
 0x7b9   :  { %v656_v10 = vmul.f32 %v2328_v52, %v654_v5 }
 0x7ba   :  { %v555_v11 = vpop.permute.xlu1 %554 }
 0x7bb   :  { %658 = vrot.lane.b32.xlu1 %v656_v10, %s2467_s27  ;;  %v557_v12 = vmul.f32 %v2330_v55, %v555_v11 }
 0x7bd   :  { %662 = vrot.lane.b32.xlu0 %v557_v12, %s2466_s26 }
 0x7bf   :  { %83 = vperm.xlu1 %2294, %v60_v13  }
 0x82d   :  { %v659_v14 = vpop.permute.xlu1 %658 }
 0x82e   :  { %2133 = vmatmul.mubr.msk.f32.vlgmr.msra.gmra.mxu0 %vm151_vm1, %v659_v14 }
 0x82f   :  { %2136 = vmatpush3.msra.mxu0 %v2584_v27  ;;  %2151 = vmatprep.mubr.msk.f32.mxu0 %vm2464_vm0, %v2463_v1  ;;  %v663_v15 = vpop.permute.xlu0 %662 }
 0x830   :  { %2137 = vmatprep.subr.mxu0 %v2463_v1  ;;  %v665_v16 = vsel %vm151_vm1, %v659_v14, %v663_v15 }
 0x831   :  { %2138 = vmatpush3.msra.mxu0 %v2586_v28  ;;  %2122 = vmatmul.mubr.msk.f32.vlgmr.msra.gmra.mxu1 %vm255_vm2, %v665_v16 }
 0x832   :  { %2139 = vmatprep.subr.mxu0 %v2463_v1  ;;  %2155 = vmatpush3.msra.mxu1 %v2528_v3 }
 0x833   :  { %2140 = vmatpush3.msra.mxu0 %v2590_v29  ;;  %2156 = vmatprep.subr.mxu1 %v2463_v1 }
 0x834   :  { %2141 = vmatprep.subr.mxu0 %v2463_v1  ;;  %2157 = vmatpush3.msra.mxu1 %v2533_v4 }
 0x835   :  { %2142 = vmatpush3.msra.mxu0 %v2594_v30  ;;  %2158 = vmatprep.subr.mxu1 %v2463_v1 }
 0x836   :  { %2143 = vmatprep.subr.mxu0 %v2463_v1  ;;  %2159 = vmatpush3.msra.mxu1 %v2543_v6 }
 0x837   :  { %2144 = vmatpush3.msra.mxu0 %v2598_v31  ;;  %2160 = vmatprep.subr.mxu1 %v2463_v1 }
 0x838   :  { %2145 = vmatprep.subr.mxu0 %v2463_v1  ;;  %2161 = vmatpush3.msra.mxu1 %v2550_v7 }
 0x839   :  { %2146 = vmatpush3.msra.mxu0 %v2602_v32  ;;  %2162 = vmatprep.mubr.msk.f32.mxu1 %vm2464_vm0, %v2463_v1 }
 0x83a   :  { %v84_v17 = vpop.permute.xlu1 %83  ;;  %2147 = vmatprep.subr.mxu0 %v2463_v1  ;;  %2165 = vmatprep.subr.mxu1 %v2463_v1 }
 0x83b   :  { %v115_v18 = vmul.f32 %v2570_v8, %v84_v17  ;;  %2148 = vmatpush3.msra.mxu0 %v2606_v34 }
 0x83c   :  { %2149 = vmatprep.subr.mxu0 %v2463_v1 }
 0x83d   :  { %v130_v19 = vadd.f32 %v2575_v9, %v115_v18  ;;  %2150 = vmatpush3.msra.mxu0 %v2613_v35 }
 0x83e   :  { %2184 = vmatprep.subr.mxu0 %v2463_v1 }
 0x83f   :  { %138 = vst [vmem:[#allocation2 + $0x6] sm:$0x3] %v130_v19 }
 0x846   :  { %v764_v20 = vld [vmem:[#allocation2 + $0x6] sm:$0x3] }
 0x8ee   :  { %v833_v21 = vpop.f32.mrf.mxu0 }
 0x8ef   :  { %v837_v22 = vadd.f32 %v833_v21, %v764_v20 }
 0x8f0   :  { %v2134_v23 = vpop.f32.mrf.mxu0 }
 0x8f1   :  { %2335 = vtanh.f32 %v837_v22  ;;  %v735_v24 = vpop.f32.mrf.mxu1  ;;  %v1896_v37 = vmul.f32 -1.442695, %v837_v22 }
 0x8f2   :  { %v736_v25 = vadd.f32 %v2657_v45, %v735_v24 }
 0x8f3   :  { %v2123_v26 = vpop.f32.mrf.mxu1 }
 0x8f4   :  { %2337 = vtanh.f32 %v736_v25  ;;  %v1894_v38 = vmul.f32 -1.442695, %v736_v25 }
 0x8f5   :  { %2339 = vpow2.f32 %v1896_v37 }
 0x8f6   :  { %2341 = vpow2.f32 %v1894_v38 }
 0x8fe   :  { %v2336_v33 = vpop.eup %2335 }
 0x8ff   :  { %847 = vrot.lane.b32.xlu1 %v2336_v33, %s2466_s26 }
 0x901   :  { %v2338_v36 = vpop.eup %2337 }
 0x902   :  { %748 = vrot.lane.b32.xlu0 %v2338_v36, %s2466_s26  ;;  %v2340_v39 = vpop.eup %2339 }
 0x903   :  { %v841_v40 = vadd.f32 1.0, %v2340_v39  ;;  %v2342_v41 = vpop.eup %2341 }
 0x904   :  { %v742_v42 = vadd.f32 1.0, %v2342_v41 }
 0x905   :  { %2343 = vrcp.f32 %v841_v40 }
 0x906   :  { %2345 = vrcp.f32 %v742_v42 }
 0x912   :  { %v2344_v43 = vpop.eup %2343 }
 0x913   :  { %v2346_v47 = vpop.eup %2345  ;;  %v845_v50 = vmul.f32 %v2344_v43, %v2717_v60 }
 0x914   :  { %v746_v53 = vmul.f32 %v2346_v47, %v2721_v63 }
 0x971   :  { %v848_v44 = vpop.permute.xlu1 %847 }
 0x972   :  { %v850_v46 = vmul.f32 %v2344_v43, %v848_v44 }
 0x974   :  { %852 = vrot.lane.b32.xlu1 %v850_v46, %s2467_s27  ;;  %v749_v48 = vpop.permute.xlu0 %748 }
 0x975   :  { %v751_v49 = vmul.f32 %v2346_v47, %v749_v48 }
 0x977   :  { %753 = vrot.lane.b32.xlu0 %v751_v49, %s2467_s27 }
 0x9e6   :  { %v853_v51 = vpop.permute.xlu1 %852 }
 0x9e7   :  { %v2770_v52 = vadd.f32 %v853_v51, %v845_v50 }
 0x9e9   :  { %2347 = vtanh.f32 %v2770_v52  ;;  %v754_v54 = vpop.permute.xlu0 %753 }
 0x9ea   :  { %v2774_v55 = vadd.f32 %v754_v54, %v746_v53 }
 0x9ec   :  { %2349 = vtanh.f32 %v2774_v55 }
 0x9f6   :  { %v2348_v56 = vpop.eup %2347 }
 0x9f7   :  { %858 = vrot.lane.b32.xlu1 %v2348_v56, %s2466_s26 }
 0x9f9   :  { %v2350_v57 = vpop.eup %2349 }
 0x9fa   :  { %759 = vrot.lane.b32.xlu0 %v2350_v57, %s2466_s26 }
 0xa69   :  { %v859_v58 = vpop.permute.xlu1 %858 }
 0xa6a   :  { %v861_v59 = vmul.f32 %v2344_v43, %v859_v58 }
 0xa6c   :  { %863 = vrot.lane.b32.xlu0 %v861_v59, %s2467_s27  ;;  %v760_v60 = vpop.permute.xlu0 %759 }
 0xa6d   :  { %v762_v62 = vmul.f32 %v2346_v47, %v760_v60 }
 0xa6f   :  { %867 = vrot.lane.b32.xlu1 %v762_v62, %s2466_s26 }
 0xa70   :  { %88 = vperm.xlu0 %2293, %v61_v61  }
 0xade   :  { %v864_v63 = vpop.permute.xlu0 %863 }
 0xadf   :  { %2163 = vmatmul.mubr.msk.f32.vlgmr.msra.gmra.mxu1 %vm151_vm1, %v864_v63 }
 0xae0   :  { %2166 = vmatpush3.msra.mxu1 %v2584_v27  ;;  %2181 = vmatprep.mubr.msk.f32.mxu1 %vm2464_vm0, %v2463_v1 }
 0xae1   :  { %2167 = vmatprep.subr.mxu1 %v2463_v1  ;;  %v868_v0 = vpop.permute.xlu1 %867 }
 0xae2   :  { %2168 = vmatpush3.msra.mxu1 %v2586_v28  ;;  %v870_v2 = vsel %vm151_vm1, %v864_v63, %v868_v0 }
 0xae3   :  { %2169 = vmatprep.subr.mxu1 %v2463_v1  ;;  %2152 = vmatmul.mubr.msk.f32.vlgmr.msra.gmra.mxu0 %vm255_vm2, %v870_v2 }
 0xae4   :  { %2170 = vmatpush3.msra.mxu1 %v2590_v29  ;;  %2185 = vmatpush3.msra.mxu0 %v2528_v3 }
 0xae5   :  { %2171 = vmatprep.subr.mxu1 %v2463_v1  ;;  %2186 = vmatprep.subr.mxu0 %v2463_v1 }
 0xae6   :  { %2172 = vmatpush3.msra.mxu1 %v2594_v30  ;;  %2187 = vmatpush3.msra.mxu0 %v2533_v4 }
 0xae7   :  { %2173 = vmatprep.subr.mxu1 %v2463_v1  ;;  %2188 = vmatprep.subr.mxu0 %v2463_v1 }
 0xae8   :  { %2174 = vmatpush3.msra.mxu1 %v2598_v31  ;;  %2189 = vmatpush3.msra.mxu0 %v2543_v6 }
 0xae9   :  { %2175 = vmatprep.subr.mxu1 %v2463_v1  ;;  %2190 = vmatprep.subr.mxu0 %v2463_v1 }
 0xaea   :  { %2192 = vmatprep.mubr.msk.f32.mxu0 %vm2464_vm0, %v2463_v1  ;;  %2191 = vmatpush3.msra.mxu0 %v2550_v7 }
 0xaeb   :  { %v89_v5 = vpop.permute.xlu0 %88  ;;  %2176 = vmatpush3.msra.mxu1 %v2602_v32  ;;  %2195 = vmatprep.subr.mxu0 %v2463_v1 }
 0xaec   :  { %v116_v10 = vmul.f32 %v2570_v8, %v89_v5  ;;  %2177 = vmatprep.subr.mxu1 %v2463_v1 }
 0xaed   :  { %2178 = vmatpush3.msra.mxu1 %v2606_v34 }
 0xaee   :  { %v131_v11 = vadd.f32 %v2575_v9, %v116_v10  ;;  %2179 = vmatprep.subr.mxu1 %v2463_v1 }
 0xaef   :  { %2180 = vmatpush3.msra.mxu1 %v2613_v35 }
 0xaf0   :  { %139 = vst [vmem:[#allocation2 + $0x8] sm:$0x3] %v131_v11  ;;  %2214 = vmatprep.subr.mxu1 %v2463_v1 }
 0xaf7   :  { %v969_v12 = vld [vmem:[#allocation2 + $0x8] sm:$0x3] }
 0xb9f   :  { %v1038_v13 = vpop.f32.mrf.mxu1 }
 0xba0   :  { %v1042_v14 = vadd.f32 %v1038_v13, %v969_v12 }
 0xba1   :  { %v2164_v15 = vpop.f32.mrf.mxu1 }
 0xba2   :  { %2351 = vtanh.f32 %v1042_v14  ;;  %v1900_v21 = vmul.f32 -1.442695, %v1042_v14 }
 0xba3   :  { %v940_v16 = vpop.f32.mrf.mxu0 }
 0xba4   :  { %v941_v17 = vadd.f32 %v2657_v45, %v940_v16 }
 0xba5   :  { %v2153_v18 = vpop.f32.mrf.mxu0 }
 0xba6   :  { %2353 = vtanh.f32 %v941_v17  ;;  %v1898_v22 = vmul.f32 -1.442695, %v941_v17 }
 0xba7   :  { %2355 = vpow2.f32 %v1900_v21 }
 0xba8   :  { %2357 = vpow2.f32 %v1898_v22 }
 0xbaf   :  { %v2352_v19 = vpop.eup %2351 }
 0xbb0   :  { %1052 = vrot.lane.b32.xlu0 %v2352_v19, %s2466_s26 }
 0xbb3   :  { %v2354_v20 = vpop.eup %2353 }
 0xbb4   :  { %953 = vrot.lane.b32.xlu1 %v2354_v20, %s2466_s26  ;;  %v2356_v23 = vpop.eup %2355 }
 0xbb5   :  { %v1046_v24 = vadd.f32 1.0, %v2356_v23  ;;  %v2358_v25 = vpop.eup %2357 }
 0xbb6   :  { %v947_v26 = vadd.f32 1.0, %v2358_v25 }
 0xbb7   :  { %2359 = vrcp.f32 %v1046_v24 }
 0xbb8   :  { %2361 = vrcp.f32 %v947_v26 }
 0xbc4   :  { %v2360_v33 = vpop.eup %2359 }
 0xbc5   :  { %v2362_v38 = vpop.eup %2361  ;;  %v1050_v41 = vmul.f32 %v2360_v33, %v2770_v52  ;;  %v62_v52 = vld [vmem:[%s3015_s0 + $0xa] sm:$0x3] }
 0xbc6   :  { %v951_v44 = vmul.f32 %v2362_v38, %v2774_v55 }
 0xc22   :  { %v1053_v36 = vpop.permute.xlu0 %1052 }
 0xc23   :  { %v1055_v37 = vmul.f32 %v2360_v33, %v1053_v36 }
 0xc25   :  { %1057 = vrot.lane.b32.xlu0 %v1055_v37, %s2467_s27  ;;  %v63_v37 = vld [vmem:[%s3015_s0 + $0xc] sm:$0x3] }
 0xc26   :  { %v954_v39 = vpop.permute.xlu1 %953 }
 0xc27   :  { %v956_v40 = vmul.f32 %v2362_v38, %v954_v39 }
 0xc29   :  { %958 = vrot.lane.b32.xlu1 %v956_v40, %s2467_s27 }
 0xc97   :  { %v1058_v42 = vpop.permute.xlu0 %1057 }
 0xc98   :  { %v2823_v43 = vadd.f32 %v1058_v42, %v1050_v41 }
 0xc9a   :  { %2363 = vtanh.f32 %v2823_v43 }
 0xc9b   :  { %v959_v46 = vpop.permute.xlu1 %958 }
 0xc9c   :  { %v2827_v47 = vadd.f32 %v959_v46, %v951_v44 }
 0xc9e   :  { %2365 = vtanh.f32 %v2827_v47 }
 0xca7   :  { %v2364_v48 = vpop.eup %2363 }
 0xca8   :  { %1063 = vrot.lane.b32.xlu0 %v2364_v48, %s2466_s26 }
 0xcab   :  { %v2366_v49 = vpop.eup %2365 }
 0xcac   :  { %964 = vrot.lane.b32.xlu1 %v2366_v49, %s2466_s26 }
 0xd1a   :  { %v1064_v50 = vpop.permute.xlu0 %1063 }
 0xd1b   :  { %v1066_v51 = vmul.f32 %v2360_v33, %v1064_v50 }
 0xd1d   :  { %1068 = vrot.lane.b32.xlu1 %v1066_v51, %s2467_s27 }
 0xd1e   :  { %v965_v53 = vpop.permute.xlu1 %964 }
 0xd1f   :  { %v967_v54 = vmul.f32 %v2362_v38, %v965_v53 }
 0xd21   :  { %93 = vperm.xlu1 %2294, %v62_v52   ;;  %1072 = vrot.lane.b32.xlu0 %v967_v54, %s2466_s26 }
 0xd8f   :  { %v1069_v55 = vpop.permute.xlu1 %1068 }
 0xd90   :  { %2193 = vmatmul.mubr.msk.f32.vlgmr.msra.gmra.mxu0 %vm151_vm1, %v1069_v55 }
 0xd91   :  { %2196 = vmatpush3.msra.mxu0 %v2584_v27  ;;  %2211 = vmatprep.mubr.msk.f32.mxu0 %vm2464_vm0, %v2463_v1 }
 0xd92   :  { %2197 = vmatprep.subr.mxu0 %v2463_v1 }
 0xd93   :  { %2198 = vmatpush3.msra.mxu0 %v2586_v28  ;;  %v1073_v56 = vpop.permute.xlu0 %1072 }
 0xd94   :  { %2199 = vmatprep.subr.mxu0 %v2463_v1  ;;  %v1075_v57 = vsel %vm151_vm1, %v1069_v55, %v1073_v56 }
 0xd95   :  { %2200 = vmatpush3.msra.mxu0 %v2590_v29  ;;  %2182 = vmatmul.mubr.msk.f32.vlgmr.msra.gmra.mxu1 %vm255_vm2, %v1075_v57 }
 0xd96   :  { %2201 = vmatprep.subr.mxu0 %v2463_v1  ;;  %2215 = vmatpush3.msra.mxu1 %v2528_v3 }
 0xd97   :  { %2202 = vmatpush3.msra.mxu0 %v2594_v30  ;;  %2216 = vmatprep.subr.mxu1 %v2463_v1 }
 0xd98   :  { %2203 = vmatprep.subr.mxu0 %v2463_v1  ;;  %2217 = vmatpush3.msra.mxu1 %v2533_v4 }
 0xd99   :  { %2204 = vmatpush3.msra.mxu0 %v2598_v31  ;;  %2218 = vmatprep.subr.mxu1 %v2463_v1 }
 0xd9a   :  { %2222 = vmatprep.mubr.msk.f32.mxu1 %vm2464_vm0, %v2463_v1  ;;  %2219 = vmatpush3.msra.mxu1 %v2543_v6 }
 0xd9b   :  { %2205 = vmatprep.subr.mxu0 %v2463_v1  ;;  %2220 = vmatprep.subr.mxu1 %v2463_v1 }
 0xd9c   :  { %v94_v3 = vpop.permute.xlu1 %93  ;;  %2206 = vmatpush3.msra.mxu0 %v2602_v32  ;;  %2221 = vmatpush3.msra.mxu1 %v2550_v7 }
 0xd9d   :  { %v117_v58 = vmul.f32 %v2570_v8, %v94_v3  ;;  %2207 = vmatprep.subr.mxu0 %v2463_v1  ;;  %2225 = vmatprep.subr.mxu1 %v2463_v1 }
 0xd9e   :  { %2208 = vmatpush3.msra.mxu0 %v2606_v34 }
 0xd9f   :  { %v132_v4 = vadd.f32 %v2575_v9, %v117_v58  ;;  %2209 = vmatprep.subr.mxu0 %v2463_v1 }
 0xda0   :  { %2210 = vmatpush3.msra.mxu0 %v2613_v35 }
 0xda1   :  { %140 = vst [vmem:[#allocation2 + $0xa] sm:$0x3] %v132_v4  ;;  %2244 = vmatprep.subr.mxu0 %v2463_v1 }
 0xda8   :  { %v1174_v6 = vld [vmem:[#allocation2 + $0xa] sm:$0x3] }
 0xe50   :  { %v1243_v59 = vpop.f32.mrf.mxu0 }
 0xe51   :  { %v1247_v8 = vadd.f32 %v1243_v59, %v1174_v6 }
 0xe52   :  { %v2194_v60 = vpop.f32.mrf.mxu0 }
 0xe53   :  { %2367 = vtanh.f32 %v1247_v8  ;;  %v1904_v0 = vmul.f32 -1.442695, %v1247_v8 }
 0xe55   :  { %v1145_v7 = vpop.f32.mrf.mxu1 }
 0xe56   :  { %v1146_v61 = vadd.f32 %v2657_v45, %v1145_v7 }
 0xe57   :  { %v2183_v62 = vpop.f32.mrf.mxu1 }
 0xe58   :  { %2369 = vtanh.f32 %v1146_v61  ;;  %v1902_v2 = vmul.f32 -1.442695, %v1146_v61 }
 0xe59   :  { %2371 = vpow2.f32 %v1904_v0 }
 0xe5a   :  { %2373 = vpow2.f32 %v1902_v2 }
 0xe60   :  { %v2368_v63 = vpop.eup %2367 }
 0xe61   :  { %1257 = vrot.lane.b32.xlu1 %v2368_v63, %s2466_s26 }
 0xe65   :  { %v2370_v9 = vpop.eup %2369 }
 0xe66   :  { %1158 = vrot.lane.b32.xlu0 %v2370_v9, %s2466_s26  ;;  %v2372_v5 = vpop.eup %2371 }
 0xe67   :  { %v1251_v10 = vadd.f32 1.0, %v2372_v5  ;;  %v2374_v11 = vpop.eup %2373 }
 0xe68   :  { %v1152_v12 = vadd.f32 1.0, %v2374_v11 }
 0xe69   :  { %2375 = vrcp.f32 %v1251_v10 }
 0xe6a   :  { %2377 = vrcp.f32 %v1152_v12  ;;  %v64_v12 = vld [vmem:[%s3015_s0 + $0xe] sm:$0x3] }
 0xe76   :  { %v2376_v13 = vpop.eup %2375 }
 0xe77   :  { %v2378_v16 = vpop.eup %2377  ;;  %v1255_v19 = vmul.f32 %v2376_v13, %v2823_v43  ;;  %v2922_v43 = vld [vmem:[%s3016_s1] ss:$0 sm:$0xff] }
 0xe78   :  { %v1156_v22 = vmul.f32 %v2378_v16, %v2827_v47 }
 0xed3   :  { %v1258_v14 = vpop.permute.xlu1 %1257 }
 0xed4   :  { %v1260_v15 = vmul.f32 %v2376_v13, %v1258_v14 }
 0xed6   :  { %1262 = vrot.lane.b32.xlu1 %v1260_v15, %s2467_s27 }
 0xed8   :  { %v1159_v17 = vpop.permute.xlu0 %1158 }
 0xed9   :  { %v1161_v18 = vmul.f32 %v2378_v16, %v1159_v17  ;;  %v2430_v17 = vld [vmem:[#allocation4 + $0x30] sm:$0xff] }
 0xedb   :  { %1163 = vrot.lane.b32.xlu0 %v1161_v18, %s2467_s27  ;;  %v2431_v18 = vld [vmem:[#allocation4 + $0x28] sm:$0xff] }
 0xf48   :  { %v1263_v20 = vpop.permute.xlu1 %1262 }
 0xf49   :  { %v2876_v21 = vadd.f32 %v1263_v20, %v1255_v19 }
 0xf4b   :  { %2379 = vtanh.f32 %v2876_v21 }
 0xf4d   :  { %v1164_v23 = vpop.permute.xlu0 %1163 }
 0xf4e   :  { %v2880_v24 = vadd.f32 %v1164_v23, %v1156_v22  ;;  %v2433_v22 = vld [vmem:[#allocation4 + $0x18] sm:$0xff]  ;;  %v2434_v23 = vld [vmem:[#allocation4 + $0x10] sm:$0xff] }
 0xf50   :  { %2381 = vtanh.f32 %v2880_v24 }
 0xf58   :  { %v2380_v25 = vpop.eup %2379 }
 0xf59   :  { %1268 = vrot.lane.b32.xlu1 %v2380_v25, %s2466_s26 }
 0xf5d   :  { %v2382_v26 = vpop.eup %2381 }
 0xf5e   :  { %1169 = vrot.lane.b32.xlu0 %v2382_v26, %s2466_s26  ;;  %v2435_v26 = vld [vmem:[#allocation4 + $0x8] sm:$0xff] }
 0xfcb   :  { %v1269_v33 = vpop.permute.xlu1 %1268 }
 0xfcc   :  { %v1271_v36 = vmul.f32 %v2376_v13, %v1269_v33 }
 0xfce   :  { %1273 = vrot.lane.b32.xlu0 %v1271_v36, %s2467_s27  ;;  %v2436_v36 = vld [vmem:[#allocation4] sm:$0xff] }
 0xfd0   :  { %v1170_v38 = vpop.permute.xlu0 %1169 }
 0xfd1   :  { %v1172_v39 = vmul.f32 %v2378_v16, %v1170_v38  ;;  %v2429_v16 = vld [vmem:[#allocation4 + $0x38] sm:$0xff] }
 0xfd2   :  { %98 = vperm.xlu0 %2293, %v63_v37  }
 0xfd3   :  { %1277 = vrot.lane.b32.xlu1 %v1172_v39, %s2466_s26 }
0x1040   :  { %v1274_v40 = vpop.permute.xlu0 %1273 }
0x1041   :  { %2223 = vmatmul.mubr.msk.f32.vlgmr.msra.gmra.mxu1 %vm151_vm1, %v1274_v40 }
0x1042   :  { %2226 = vmatpush3.msra.mxu1 %v2584_v27  ;;  %2241 = vmatprep.mubr.msk.f32.mxu1 %vm2464_vm0, %v2463_v1  ;;  %v2423_v27 = vld [vmem:[%s3017_s2 + $0x18] sm:$0xff] }
0x1043   :  { %2227 = vmatprep.subr.mxu1 %v2463_v1 }
0x1044   :  { %2228 = vmatpush3.msra.mxu1 %v2586_v28  ;;  %v2424_v28 = vld [vmem:[%s3017_s2 + $0x10] sm:$0xff] }
0x1045   :  { %2229 = vmatprep.subr.mxu1 %v2463_v1  ;;  %v1278_v41 = vpop.permute.xlu1 %1277 }
0x1046   :  { %2230 = vmatpush3.msra.mxu1 %v2590_v29  ;;  %v1280_v42 = vsel %vm151_vm1, %v1274_v40, %v1278_v41 }
0x1047   :  { %2231 = vmatprep.subr.mxu1 %v2463_v1  ;;  %2212 = vmatmul.mubr.msk.f32.vlgmr.msra.gmra.mxu0 %vm255_vm2, %v1280_v42  ;;  %v2437_v42 = vld [vmem:[%s3020_s5] ss:$0 sm:$0xff] }
0x1048   :  { %2232 = vmatpush3.msra.mxu1 %v2594_v30  ;;  %2245 = vmatpush3.msra.mxu0 %v2423_v27  ;;  %v2425_v30 = vld [vmem:[%s3017_s2 + $0x8] sm:$0xff] }
0x1049   :  { %2233 = vmatprep.subr.mxu1 %v2463_v1  ;;  %2246 = vmatprep.subr.mxu0 %v2463_v1 }
0x104a   :  { %2252 = vmatprep.mubr.msk.f32.mxu0 %vm2464_vm0, %v2463_v1  ;;  %2247 = vmatpush3.msra.mxu0 %v2424_v28 }
0x104b   :  { %2234 = vmatpush3.msra.mxu1 %v2598_v31  ;;  %2248 = vmatprep.subr.mxu0 %v2463_v1  ;;  %v2427_v31 = vld [vmem:[%s3017_s2] sm:$0xff] }
0x104c   :  { %2235 = vmatprep.subr.mxu1 %v2463_v1  ;;  %2249 = vmatpush3.msra.mxu0 %v2425_v30 }
0x104d   :  { %v99_v29 = vpop.permute.xlu0 %98  ;;  %2236 = vmatpush3.msra.mxu1 %v2602_v32  ;;  %2250 = vmatprep.subr.mxu0 %v2463_v1  ;;  %v2934_v32 = vld [vmem:[%s3018_s3] ss:$0 sm:$0xff] }
0x104e   :  { %v118_v44 = vmul.f32 %v2922_v43, %v99_v29  ;;  %2237 = vmatprep.subr.mxu1 %v2463_v1  ;;  %2251 = vmatpush3.msra.mxu0 %v2427_v31 }
0x104f   :  { %2238 = vmatpush3.msra.mxu1 %v2606_v34  ;;  %2255 = vmatprep.subr.mxu0 %v2463_v1 }
0x1050   :  { %v133_v46 = vadd.f32 %v2934_v32, %v118_v44  ;;  %2239 = vmatprep.subr.mxu1 %v2463_v1 }
0x1051   :  { %2240 = vmatpush3.msra.mxu1 %v2613_v35 }
0x1052   :  { %141 = vst [vmem:[#allocation2 + $0xc] sm:$0x3] %v133_v46  ;;  %2274 = vmatprep.subr.mxu1 %v2463_v1 }
0x1059   :  { %v1379_v47 = vld [vmem:[#allocation2 + $0xc] sm:$0x3] }
0x1101   :  { %v1448_v48 = vpop.f32.mrf.mxu1 }
0x1102   :  { %v1452_v49 = vadd.f32 %v1448_v48, %v1379_v47 }
0x1103   :  { %v2224_v34 = vpop.f32.mrf.mxu1 }
0x1104   :  { %2383 = vtanh.f32 %v1452_v49  ;;  %v1908_v35 = vmul.f32 -1.442695, %v1452_v49 }
0x1107   :  { %v1350_v50 = vpop.f32.mrf.mxu0 }
0x1108   :  { %v1351_v51 = vadd.f32 %v2657_v45, %v1350_v50 }
0x1109   :  { %v2213_v52 = vpop.f32.mrf.mxu0 }
0x110a   :  { %2385 = vtanh.f32 %v1351_v51  ;;  %v1906_v55 = vmul.f32 -1.442695, %v1351_v51 }
0x110b   :  { %2387 = vpow2.f32 %v1908_v35 }
0x110c   :  { %2389 = vpow2.f32 %v1906_v55 }
0x1111   :  { %v2384_v53 = vpop.eup %2383 }
0x1112   :  { %1462 = vrot.lane.b32.xlu0 %v2384_v53, %s2466_s26 }
0x1117   :  { %v2386_v54 = vpop.eup %2385 }
0x1118   :  { %1363 = vrot.lane.b32.xlu1 %v2386_v54, %s2466_s26  ;;  %v2388_v56 = vpop.eup %2387 }
0x1119   :  { %v1456_v57 = vadd.f32 1.0, %v2388_v56  ;;  %v2390_v3 = vpop.eup %2389 }
0x111a   :  { %v1357_v58 = vadd.f32 1.0, %v2390_v3 }
0x111b   :  { %2391 = vrcp.f32 %v1456_v57 }
0x111c   :  { %2393 = vrcp.f32 %v1357_v58 }
0x1128   :  { %v2392_v4 = vpop.eup %2391 }
0x1129   :  { %v2394_v59 = vpop.eup %2393  ;;  %v1460_v7 = vmul.f32 %v2392_v4, %v2876_v21  ;;  %v2432_v21 = vld [vmem:[#allocation4 + $0x20] sm:$0xff] }
0x112a   :  { %v1361_v63 = vmul.f32 %v2394_v59, %v2880_v24 }
0x1184   :  { %v1463_v45 = vpop.permute.xlu0 %1462 }
0x1185   :  { %v1465_v6 = vmul.f32 %v2392_v4, %v1463_v45 }
0x1187   :  { %1467 = vrot.lane.b32.xlu0 %v1465_v6, %s2467_s27 }
0x118a   :  { %v1364_v8 = vpop.permute.xlu1 %1363 }
0x118b   :  { %v1366_v60 = vmul.f32 %v2394_v59, %v1364_v8 }
0x118d   :  { %1368 = vrot.lane.b32.xlu1 %v1366_v60, %s2467_s27 }
0x11f9   :  { %v1468_v61 = vpop.permute.xlu0 %1467 }
0x11fa   :  { %v2947_v62 = vadd.f32 %v1468_v61, %v1460_v7 }
0x11fc   :  { %2395 = vtanh.f32 %v2947_v62 }
0x11ff   :  { %v1369_v9 = vpop.permute.xlu1 %1368 }
0x1200   :  { %v2951_v0 = vadd.f32 %v1369_v9, %v1361_v63 }
0x1202   :  { %2397 = vtanh.f32 %v2951_v0 }
0x1209   :  { %v2396_v2 = vpop.eup %2395 }
0x120a   :  { %1473 = vrot.lane.b32.xlu0 %v2396_v2, %s2466_s26 }
0x120f   :  { %v2398_v5 = vpop.eup %2397 }
0x1210   :  { %1374 = vrot.lane.b32.xlu1 %v2398_v5, %s2466_s26 }
0x127c   :  { %v1474_v10 = vpop.permute.xlu0 %1473 }
0x127d   :  { %v1476_v11 = vmul.f32 %v2392_v4, %v1474_v10 }
0x127f   :  { %1478 = vrot.lane.b32.xlu1 %v1476_v11, %s2467_s27 }
0x1282   :  { %v1375_v13 = vpop.permute.xlu1 %1374 }
0x1283   :  { %103 = vperm.xlu1 %2294, %v64_v12   ;;  %v1377_v14 = vmul.f32 %v2394_v59, %v1375_v13 }
0x1285   :  { %1482 = vrot.lane.b32.xlu0 %v1377_v14, %s2466_s26 }
0x12f1   :  { %v1479_v15 = vpop.permute.xlu1 %1478 }
0x12f2   :  { %2253 = vmatmul.mubr.msk.f32.vlgmr.msra.gmra.mxu0 %vm151_vm1, %v1479_v15 }
0x12f3   :  { %2256 = vmatpush3.msra.mxu0 %v2429_v16  ;;  %2271 = vmatprep.mubr.msk.f32.mxu0 %vm2464_vm0, %v2463_v1  ;;  %v1791_v16 = vld [vmem:[%s3021_s6 + $0x18] sm:$0xff] }
0x12f4   :  { %2257 = vmatprep.subr.mxu0 %v2463_v1 }
0x12f5   :  { %2258 = vmatpush3.msra.mxu0 %v2430_v17  ;;  %v1790_v17 = vld [vmem:[%s3021_s6 + $0x10] sm:$0xff] }
0x12f6   :  { %2259 = vmatprep.subr.mxu0 %v2463_v1 }
0x12f7   :  { %2260 = vmatpush3.msra.mxu0 %v2431_v18  ;;  %v1483_v19 = vpop.permute.xlu0 %1482  ;;  %v1789_v18 = vld [vmem:[%s3021_s6 + $0x8] sm:$0xff] }
0x12f8   :  { %2261 = vmatprep.subr.mxu0 %v2463_v1  ;;  %v1485_v20 = vsel %vm151_vm1, %v1479_v15, %v1483_v19  ;;  %v1788_v19 = vld [vmem:[%s3021_s6] sm:$0xff] }
0x12f9   :  { %2262 = vmatpush3.msra.mxu0 %v2432_v21  ;;  %2242 = vmatmul.mubr.msk.f32.vlgmr.msra.gmra.mxu1 %vm255_vm2, %v1485_v20 }
0x12fa   :  { %2263 = vmatprep.subr.mxu0 %v2463_v1  ;;  %2282 = vmatprep.mubr.msk.f32.mxu1 %vm2464_vm0, %v2463_v1 }
0x12fb   :  { %2264 = vmatpush3.msra.mxu0 %v2433_v22  ;;  %2275 = vmatpush3.msra.mxu1 %v1791_v16 }
0x12fc   :  { %2265 = vmatprep.subr.mxu0 %v2463_v1  ;;  %2276 = vmatprep.subr.mxu1 %v2463_v1 }
0x12fd   :  { %2266 = vmatpush3.msra.mxu0 %v2434_v23  ;;  %2277 = vmatpush3.msra.mxu1 %v1790_v17 }
0x12fe   :  { %v104_v24 = vpop.permute.xlu1 %103  ;;  %2267 = vmatprep.subr.mxu0 %v2463_v1  ;;  %2278 = vmatprep.subr.mxu1 %v2463_v1 }
0x12ff   :  { %v119_v25 = vmul.f32 %v2922_v43, %v104_v24  ;;  %2268 = vmatpush3.msra.mxu0 %v2435_v26  ;;  %2279 = vmatpush3.msra.mxu1 %v1789_v18  ;;  %v1915_v24 = vld [vmem:[#allocation3] ss:$0 sm:$0xff] }
0x1300   :  { %2269 = vmatprep.subr.mxu0 %v2463_v1  ;;  %2280 = vmatprep.subr.mxu1 %v2463_v1 }
0x1301   :  { %v134_v33 = vadd.f32 %v2934_v32, %v119_v25  ;;  %2270 = vmatpush3.msra.mxu0 %v2436_v36  ;;  %2281 = vmatpush3.msra.mxu1 %v1788_v19 }
0x1303   :  { %142 = vst [vmem:[#allocation2 + $0xe] sm:$0x3] %v134_v33 }
0x130a   :  { %v1584_v37 = vld [vmem:[#allocation2 + $0xe] sm:$0x3] }
0x13b2   :  { %v1653_v38 = vpop.f32.mrf.mxu0 }
0x13b3   :  { %v1657_v39 = vadd.f32 %v1653_v38, %v1584_v37 }
0x13b4   :  { %v2254_v40 = vpop.f32.mrf.mxu0 }
0x13b5   :  { %2399 = vtanh.f32 %v1657_v39  ;;  %v1912_v43 = vmul.f32 -1.442695, %v1657_v39 }
0x13b9   :  { %v1555_v41 = vpop.f32.mrf.mxu1 }
0x13ba   :  { %v1556_v27 = vadd.f32 %v2437_v42, %v1555_v41 }
0x13bb   :  { %v2243_v28 = vpop.f32.mrf.mxu1 }
0x13bc   :  { %2401 = vtanh.f32 %v1556_v27  ;;  %v1910_v44 = vmul.f32 -1.442695, %v1556_v27 }
0x13bd   :  { %2403 = vpow2.f32 %v1912_v43 }
0x13be   :  { %2405 = vpow2.f32 %v1910_v44 }
0x13c2   :  { %v2400_v29 = vpop.eup %2399 }
0x13c3   :  { %1667 = vrot.lane.b32.xlu1 %v2400_v29, %s2466_s26 }
0x13c9   :  { %v2402_v30 = vpop.eup %2401 }
0x13ca   :  { %1568 = vrot.lane.b32.xlu0 %v2402_v30, %s2466_s26  ;;  %v2404_v31 = vpop.eup %2403 }
0x13cb   :  { %v1661_v32 = vadd.f32 1.0, %v2404_v31  ;;  %v2406_v46 = vpop.eup %2405 }
0x13cc   :  { %v1562_v47 = vadd.f32 1.0, %v2406_v46 }
0x13cd   :  { %2407 = vrcp.f32 %v1661_v32 }
0x13ce   :  { %2409 = vrcp.f32 %v1562_v47 }
0x13da   :  { %v2408_v48 = vpop.eup %2407 }
0x13db   :  { %v2410_v50 = vpop.eup %2409  ;;  %v1665_v53 = vmul.f32 %v2408_v48, %v2947_v62 }
0x13dc   :  { %v1566_v55 = vmul.f32 %v2410_v50, %v2951_v0 }
0x1435   :  { %v1668_v49 = vpop.permute.xlu1 %1667 }
0x1436   :  { %v1670_v34 = vmul.f32 %v2408_v48, %v1668_v49 }
0x1438   :  { %1672 = vrot.lane.b32.xlu1 %v1670_v34, %s2467_s27 }
0x143c   :  { %v1569_v51 = vpop.permute.xlu0 %1568 }
0x143d   :  { %v1571_v52 = vmul.f32 %v2410_v50, %v1569_v51 }
0x143f   :  { %1573 = vrot.lane.b32.xlu0 %v1571_v52, %s2467_s27 }
0x14aa   :  { %v1673_v54 = vpop.permute.xlu1 %1672 }
0x14ab   :  { %v1675_v35 = vadd.f32 %v1673_v54, %v1665_v53 }
0x14ad   :  { %2411 = vtanh.f32 %v1675_v35 }
0x14b1   :  { %v1574_v56 = vpop.permute.xlu0 %1573 }
0x14b2   :  { %v1576_v57 = vadd.f32 %v1574_v56, %v1566_v55 }
0x14b4   :  { %2413 = vtanh.f32 %v1576_v57 }
0x14ba   :  { %v2412_v3 = vpop.eup %2411 }
0x14bb   :  { %1678 = vrot.lane.b32.xlu1 %v2412_v3, %s2466_s26 }
0x14c1   :  { %v2414_v58 = vpop.eup %2413 }
0x14c2   :  { %1579 = vrot.lane.b32.xlu0 %v2414_v58, %s2466_s26 }
0x152d   :  { %v1679_v4 = vpop.permute.xlu1 %1678 }
0x152e   :  { %v1681_v45 = vmul.f32 %v2408_v48, %v1679_v4 }
0x1530   :  { %1683 = vrot.lane.b32.xlu0 %v1681_v45, %s2467_s27 }
0x1534   :  { %v1580_v6 = vpop.permute.xlu0 %1579 }
0x1535   :  { %v1582_v59 = vmul.f32 %v2410_v50, %v1580_v6 }
0x1537   :  { %1687 = vrot.lane.b32.xlu1 %v1582_v59, %s2466_s26 }
0x15a2   :  { %v1684_v8 = vpop.permute.xlu0 %1683 }
0x15a9   :  { %v1688_v60 = vpop.permute.xlu1 %1687 }
0x15aa   :  { %v1690_v7 = vsel %vm151_vm1, %v1684_v8, %v1688_v60 }
0x15ab   :  { %2272 = vmatmul.mubr.msk.f32.vlgmr.msra.gmra.mxu0 %vm255_vm2, %v1690_v7 }
0x166b   :  { %v1760_v61 = vpop.f32.mrf.mxu0 }
0x166c   :  { %v1761_v62 = vadd.f32 %v2437_v42, %v1760_v61 }
0x166d   :  { %v2273_v63 = vpop.f32.mrf.mxu0 }
0x166e   :  { %2415 = vtanh.f32 %v1761_v62  ;;  %v1914_v0 = vmul.f32 -1.442695, %v1761_v62 }
0x1670   :  { %2417 = vpow2.f32 %v1914_v0 }
0x167b   :  { %v2416_v9 = vpop.eup %2415 }
0x167c   :  { %1773 = vrot.lane.b32.xlu0 %v2416_v9, %s2466_s26 }
0x167d   :  { %v2418_v2 = vpop.eup %2417 }
0x167e   :  { %v1767_v5 = vadd.f32 1.0, %v2418_v2 }
0x1680   :  { %2419 = vrcp.f32 %v1767_v5 }
0x168d   :  { %v2420_v10 = vpop.eup %2419 }
0x168e   :  { %v1771_v13 = vmul.f32 %v2420_v10, %v1576_v57 }
0x16ee   :  { %v1774_v11 = vpop.permute.xlu0 %1773 }
0x16ef   :  { %v1776_v12 = vmul.f32 %v2420_v10, %v1774_v11 }
0x16f1   :  { %1778 = vrot.lane.b32.xlu1 %v1776_v12, %s2467_s27 }
0x1763   :  { %v1779_v14 = vpop.permute.xlu1 %1778 }
0x1764   :  { %v1781_v15 = vadd.f32 %v1779_v14, %v1771_v13 }
0x1766   :  { %2421 = vtanh.f32 %v1781_v15 }
0x1773   :  { %v2422_v20 = vpop.eup %2421 }
0x1774   :  { %1784 = vrot.lane.b32.xlu0 %v2422_v20, %s2466_s26 }
0x17e6   :  { %v1785_v21 = vpop.permute.xlu0 %1784 }
0x17e7   :  { %v1787_v22 = vmul.f32 %v2420_v10, %v1785_v21 }
0x17e9   :  { %1800 = vrot.lane.b32.xlu1 %v1787_v22, %s2467_s27 }
0x185b   :  { %v1801_v23 = vpop.permute.xlu1 %1800 }
0x185c   :  { %2283 = vmatmul.mubr.msk.f32.vlgmr.msra.gmra.mxu1 %vm151_vm1, %v1801_v23 }
0x191c   :  { %v1870_v25 = vpop.f32.mrf.mxu1 }
0x191d   :  { %v1871_v26 = vadd.f32 %v1915_v24, %v1870_v25 }
0x191e   :  { %v2284_v33 = vpop.f32.mrf.mxu1 }
0x191f   :  { %1875 = vst.msk [vmem:[%s3023_s8] sm:$0x3] %vm1874_vm3, %v1871_v26 }
0x1920   :  { %1880 = vsyncpa [#allocation5], 1 }

</bundles_post_ra>
